<compile_context>
chip_gen: v7x
topology: tpu7x:2x2x1
jax: 0.10.0
libtpu: 0.0.40
codegen_flags: <defaults>
</compile_context>

<pallas_src>
import functools

import numpy as np
import jax
import jax.numpy as jnp
from jax.experimental import pallas as pl
from jax.experimental.pallas import tpu as pltpu


_LANE = 128
_NEG = -1e30                      # safe "-inf" (avoids inf-inf NaNs)
_VMEM_LIMIT = 48 * 1024 * 1024    # explicit scoped-VMEM limit (review item)


def _round_up(x, m):
    return ((x + m - 1) // m) * m


# --------------------- Phase 1: projection + L2 norm -------------------------
def _proj_norm_kernel(scale_ref, af_ref, tf_ref, wa_ref, wt_ref,
                      a_out_ref, t_t_out_ref):
    """Per row tile: two bf16 MXU projections, f32 L2 norm, logit scale folded
    into the audio side; emits bf16 a_s [T,P] and text side pre-transposed
    t_n^T [P,T] so phase 2 never needs an RHS transpose."""
    scale = scale_ref[0]                                        # f32 (SMEM)
    a = jnp.dot(af_ref[...], wa_ref[...], preferred_element_type=jnp.float32)
    t = jnp.dot(tf_ref[...], wt_ref[...], preferred_element_type=jnp.float32)
    a_n = a * jax.lax.rsqrt(
        jnp.maximum(jnp.sum(a * a, axis=-1, keepdims=True), 1e-12))
    t_n = t * jax.lax.rsqrt(
        jnp.maximum(jnp.sum(t * t, axis=-1, keepdims=True), 1e-12))
    a_out_ref[...] = (a_n * scale).astype(a_out_ref.dtype)      # bf16, scaled
    t_t_out_ref[...] = t_n.T.astype(t_t_out_ref.dtype)          # bf16, [P, T]


# ---------------- Phase 2: tiled logits + symmetric CLIP loss ----------------
def _logits_loss_kernel(valid_b, a_ref, tT_ref, logits_ref, loss_ref,
                        m_row, l_row, col_m, col_l,
                        rlse_acc, clse_acc, diag_acc):
    i = pl.program_id(0)            # row (audio) tile — outer
    j = pl.program_id(1)            # col (text) tile — inner
    nq = pl.num_programs(0)
    nk = pl.num_programs(1)
    tq = a_ref.shape[0]
    tk = tT_ref.shape[1]

    # bf16 x bf16 -> f32 MXU matmul; RHS already [P, tk] (no hidden transpose).
    s = jnp.dot(a_ref[...], tT_ref[...], preferred_element_type=jnp.float32)
    logits_ref[...] = s                                         # lane-dense f32

    row_ids = i * tq + jax.lax.broadcasted_iota(jnp.int32, (tq, 1), 0)
    col_ids = j * tk + jax.lax.broadcasted_iota(jnp.int32, (1, tk), 1)
    row_valid = row_ids < valid_b                               # [tq, 1]
    col_valid = col_ids < valid_b                               # [1, tk]

    @pl.when(jnp.logical_and(i == 0, j == 0))
    def _():
        rlse_acc[...] = jnp.zeros_like(rlse_acc)
        clse_acc[...] = jnp.zeros_like(clse_acc)
        diag_acc[...] = jnp.zeros_like(diag_acc)

    # ---- audio CE: row-wise online LSE, accumulated across the j axis ----
    s_row = jnp.where(col_valid, s, _NEG)

    @pl.when(j == 0)
    def _():
        m_row[...] = jnp.full_like(m_row, _NEG)
        l_row[...] = jnp.zeros_like(l_row)

    m_prev = m_row[...]
    m_new = jnp.maximum(m_prev, jnp.max(s_row, axis=-1, keepdims=True))
    l_row[...] = (l_row[...] * jnp.exp(m_prev - m_new)
                  + jnp.sum(jnp.exp(s_row - m_new), axis=-1, keepdims=True))
    m_row[...] = m_new

    # ---- text CE: column-wise online LSE, accumulated across the i axis ----
    s_col = jnp.where(row_valid, s, _NEG)

    @pl.when(i == 0)
    def _():
        col_m[j] = jnp.full((1, tk), _NEG, dtype=jnp.float32)
        col_l[j] = jnp.zeros((1, tk), dtype=jnp.float32)

    cm_prev = col_m[j]
    cm_new = jnp.maximum(cm_prev, jnp.max(s_col, axis=0, keepdims=True))
    col_l[j] = (col_l[j] * jnp.exp(cm_prev - cm_new)
                + jnp.sum(jnp.exp(s_col - cm_new), axis=0, keepdims=True))
    col_m[j] = cm_new

    # ---- diagonal logits[r, r] (shared by both CEs) lives in i == j tiles ----
    @pl.when(i == j)
    def _():
        rid = jax.lax.broadcasted_iota(jnp.int32, (tq, tk), 0)
        cid = jax.lax.broadcasted_iota(jnp.int32, (tq, tk), 1)
        on_diag = jnp.logical_and(rid == cid, col_valid)
        diag_acc[...] += jnp.sum(jnp.where(on_diag, s, 0.0), keepdims=True)

    # ---- finalize audio-CE contribution of this row tile ----
    @pl.when(j == nk - 1)
    def _():
        row_lse = m_row[...] + jnp.log(l_row[...])              # [tq, 1]
        rlse_acc[...] += jnp.sum(jnp.where(row_valid, row_lse, 0.0),
                                 keepdims=True)

    # ---- finalize text-CE contribution of this column tile ----
    @pl.when(i == nq - 1)
    def _():
        col_lse = col_m[j] + jnp.log(col_l[j])                  # [1, tk]
        clse_acc[...] += jnp.sum(jnp.where(col_valid, col_lse, 0.0),
                                 keepdims=True)

    # ---- scalar symmetric CLIP loss at the very last grid step ----
    @pl.when(jnp.logical_and(i == nq - 1, j == nk - 1))
    def _():
        loss_ref[...] = (0.5 / valid_b) * (
            rlse_acc[...] + clse_acc[...] - 2.0 * diag_acc[...])


# ------------------------------- Wrapper --------------------------------------
@jax.jit
def muscall_forward(audio_features, text_pooled, w_audio, w_text, logit_scale):
    """MusCALL contrastive head.  Returns (logits_per_audio, logits_per_text,
    clip_loss) from the encoders' pooled outputs and projection weights."""
    B, Da = audio_features.shape
    Dt = text_pooled.shape[1]
    P = w_audio.shape[1]

    T = _LANE                       # tile edge; use 256/512 at production B
    Bp = _round_up(B, T)
    Pp = _round_up(P, _LANE)        # zero-padding P changes nothing (exact)
    Ka = _round_up(Da, _LANE)
    Kt = _round_up(Dt, _LANE)
    nq = Bp // T
    nk = Bp // T

    bf16 = jnp.bfloat16
    # Single pad per array (no .at[].set passes).
    af = jnp.pad(audio_features.astype(bf16), ((0, Bp - B), (0, Ka - Da)))
    tf = jnp.pad(text_pooled.astype(bf16), ((0, Bp - B), (0, Kt - Dt)))
    wa = jnp.pad(w_audio.astype(bf16), ((0, Ka - Da), (0, Pp - P)))
    wt = jnp.pad(w_text.astype(bf16), ((0, Kt - Dt), (0, Pp - P)))
    scale = jnp.asarray(logit_scale, jnp.float32).reshape((1,))

    # --- phase 1: projections + L2 norm (gridded over row tiles) ---
    a_s, t_nT = pl.pallas_call(
        _proj_norm_kernel,
        out_shape=(jax.ShapeDtypeStruct((Bp, Pp), bf16),     # scale * a_n
                   jax.ShapeDtypeStruct((Pp, Bp), bf16)),    # t_n, transposed
        grid=(nq,),
        in_specs=[
            pl.BlockSpec(memory_space=pltpu.MemorySpace.SMEM),   # logit scale
            pl.BlockSpec((T, Ka), lambda i: (i, 0)),             # audio rows
            pl.BlockSpec((T, Kt), lambda i: (i, 0)),             # text rows
            pl.BlockSpec((Ka, Pp), lambda i: (0, 0)),            # W_a resident
            pl.BlockSpec((Kt, Pp), lambda i: (0, 0)),            # W_t resident
        ],
        out_specs=(
            pl.BlockSpec((T, Pp), lambda i: (i, 0)),
            pl.BlockSpec((Pp, T), lambda i: (0, i)),
        ),
        compiler_params=pltpu.CompilerParams(
            dimension_semantics=("parallel",),
            vmem_limit_bytes=_VMEM_LIMIT),
    )(scale, af, tf, wa, wt)

    # --- phase 2: tiled logits + streaming-LSE symmetric CLIP loss ---
    cost = pl.CostEstimate(
        flops=2 * Bp * Bp * Pp,
        transcendentals=2 * Bp * Bp + 4 * Bp,
        bytes_accessed=Bp * Pp * 2 * (1 + nq) + Bp * Bp * 4 + 4,
    )
    # Both grid axes "arbitrary": the column-LSE accumulates across the row
    # axis, so the grid must run sequentially (per-core partial LSEs would be
    # needed to re-enable megacore sharding on v7x).
    logits_full, loss = pl.pallas_call(
        functools.partial(_logits_loss_kernel, B),
        out_shape=(jax.ShapeDtypeStruct((Bp, Bp), jnp.float32),  # logits_per_audio
                   jax.ShapeDtypeStruct((1, 1), jnp.float32)),   # clip loss
        grid=(nq, nk),
        in_specs=[
            pl.BlockSpec((T, Pp), lambda i, j: (i, 0)),          # a_s row tile
            pl.BlockSpec((Pp, T), lambda i, j: (0, j)),          # t_n^T col tile
        ],
        out_specs=(
            pl.BlockSpec((T, T), lambda i, j: (i, j)),           # lane-dense
            pl.BlockSpec((1, 1), lambda i, j: (0, 0)),           # resident loss
        ),
        scratch_shapes=[
            pltpu.VMEM((T, 1), jnp.float32),       # m_row  (per row sweep)
            pltpu.VMEM((T, 1), jnp.float32),       # l_row
            pltpu.VMEM((nk, 1, T), jnp.float32),   # col_m  (persistent)
            pltpu.VMEM((nk, 1, T), jnp.float32),   # col_l
            pltpu.VMEM((1, 1), jnp.float32),       # sum of row LSEs
            pltpu.VMEM((1, 1), jnp.float32),       # sum of col LSEs
            pltpu.VMEM((1, 1), jnp.float32),       # sum of diagonal logits
        ],
        compiler_params=pltpu.CompilerParams(
            dimension_semantics=("arbitrary", "arbitrary"),
            vmem_limit_bytes=_VMEM_LIMIT),
        cost_estimate=cost,
    )(a_s, t_nT)

    logits_per_audio = logits_full[:B, :B]
    logits_per_text = logits_per_audio.T          # exact transpose, in wrapper
    return logits_per_audio, logits_per_text, loss[0, 0]


# ------------------------------- Reference ------------------------------------
def reference_forward(audio_features, text_pooled, w_audio, w_text, scale):
    """Pure-JAX f32 reference of the MusCALL contrastive head."""
    hi = jax.lax.Precision.HIGHEST
    a = jnp.dot(audio_features.astype(jnp.float32), w_audio.astype(jnp.float32),
                precision=hi)
    t = jnp.dot(text_pooled.astype(jnp.float32), w_text.astype(jnp.float32),
                precision=hi)
    a = a / jnp.linalg.norm(a, axis=-1, keepdims=True)
    t = t / jnp.linalg.norm(t, axis=-1, keepdims=True)
    logits_a = scale * jnp.dot(a, t.T, precision=hi)
    logits_t = logits_a.T
    labels = jnp.arange(logits_a.shape[0])

    def ce(logits):
        lse = jax.scipy.special.logsumexp(logits, axis=-1)
        return jnp.mean(lse - logits[jnp.arange(logits.shape[0]), labels])

    loss = 0.5 * (ce(logits_t) + ce(logits_a))
    return logits_a, logits_t, loss


if __name__ == "__main__":
    # Small, module-consistent shapes.
    batch = 8
    audio_dim = 64        # audio_config.hidden_size
    text_dim = 32         # text_config.hidden_size
    projection_dim = 128  # config.projection_dim

    key = jax.random.PRNGKey(0)
    k1, k2, k3, k4 = jax.random.split(key, 4)

    # Stand-ins for ModifiedResNet / TextTransformer pooled features, stored
    # as bf16 (the dtype fed to the MXU); the f32 reference consumes the same
    # bf16-quantized values.
    audio_features = jax.random.normal(
        k1, (batch, audio_dim), dtype=jnp.float32).astype(jnp.bfloat16)
    text_pooled = jax.random.normal(
        k2, (batch, text_dim), dtype=jnp.float32).astype(jnp.bfloat16)

    # Projection weights, [in_dim, proj_dim] so that x @ W == nn.Linear(bias=False).
    w_audio = (jax.random.normal(k3, (audio_dim, projection_dim), dtype=jnp.float32)
               / jnp.sqrt(audio_dim)).astype(jnp.bfloat16)
    w_text = (jax.random.normal(k4, (text_dim, projection_dim), dtype=jnp.float32)
              / jnp.sqrt(text_dim)).astype(jnp.bfloat16)

    # temperature is None in the default config => logit_scale = exp(log(1/0.07)).
    logit_scale = jnp.asarray([float(np.exp(np.log(1.0 / 0.07)))], dtype=jnp.float32)

    logits_a, logits_t, loss = muscall_forward(
        audio_features, text_pooled, w_audio, w_text, logit_scale)
    jax.block_until_ready((logits_a, logits_t, loss))

    ref_a, ref_t, ref_loss = reference_forward(
        audio_features, text_pooled, w_audio, w_text, float(logit_scale[0]))

    # Tolerances relaxed vs. the f32 reference because the normalized vectors
    # feeding the similarity matmul are bf16 (review: required for v5e MXU).
    assert np.allclose(np.asarray(logits_a), np.asarray(ref_a), atol=2.5e-2, rtol=2.5e-2)
    assert np.allclose(np.asarray(logits_t), np.asarray(ref_t), atol=2.5e-2, rtol=2.5e-2)
    # logits_per_text is exactly the transpose of logits_per_audio.
    assert np.array_equal(np.asarray(logits_t), np.asarray(logits_a).T)
    assert np.allclose(float(loss), float(ref_loss), atol=2.5e-2, rtol=2.5e-2)

    print("KERNEL_OK")
</pallas_src>

<mosaic_0001>
module attributes {stable_mosaic.version = 11 : i64} {
  func.func @_proj_norm_kernel(%arg0: i32, %arg1: memref<1xf32, #tpu.memory_space<smem>>, %arg2: memref<128x128xbf16, #tpu.memory_space<vmem>>, %arg3: memref<128x128xbf16, #tpu.memory_space<vmem>>, %arg4: memref<128x128xbf16, #tpu.memory_space<vmem>>, %arg5: memref<128x128xbf16, #tpu.memory_space<vmem>>, %arg6: memref<128x128xbf16, #tpu.memory_space<vmem>>, %arg7: memref<128x128xbf16, #tpu.memory_space<vmem>>) attributes {dimension_semantics = [#tpu.dimension_semantics<parallel>], iteration_bounds = array<i64: 1>, scalar_prefetch = 0 : i64, scratch_operands = 0 : i64, tpu.core_type = #tpu.core_type<tc>, window_params = [{transform_indices = @transform_0, window_bounds = array<i64: 1>}, {transform_indices = @transform_1, window_bounds = array<i64: 128, 128>}, {transform_indices = @transform_2, window_bounds = array<i64: 128, 128>}, {pipeline_mode = #tpu.pipeline_mode<synchronous>, transform_indices = @transform_3, window_bounds = array<i64: 128, 128>}, {pipeline_mode = #tpu.pipeline_mode<synchronous>, transform_indices = @transform_4, window_bounds = array<i64: 128, 128>}, {transform_indices = @transform_5, window_bounds = array<i64: 128, 128>}, {transform_indices = @transform_6, window_bounds = array<i64: 128, 128>}]} {
    %c0 = arith.constant 0 : index
    %0 = memref.load %arg1[%c0] : memref<1xf32, #tpu.memory_space<smem>>
    %c0_0 = arith.constant 0 : index
    %c0_1 = arith.constant 0 : index
    %1 = vector.load %arg2[%c0_0, %c0_1] : memref<128x128xbf16, #tpu.memory_space<vmem>>, vector<128x128xbf16>
    %c0_2 = arith.constant 0 : index
    %c0_3 = arith.constant 0 : index
    %2 = vector.load %arg4[%c0_2, %c0_3] : memref<128x128xbf16, #tpu.memory_space<vmem>>, vector<128x128xbf16>
    %cst = arith.constant dense<0.000000e+00> : vector<128x128xf32>
    %3 = tpu.matmul %1, %2, %cst {dimension_numbers = #tpu.dot_dimension_numbers<[1], [0], [0], [1], [0, 0, 1, 1], [], []>} : vector<128x128xbf16>, vector<128x128xbf16>, vector<128x128xf32> -> vector<128x128xf32>
    %c0_4 = arith.constant 0 : index
    %c0_5 = arith.constant 0 : index
    %4 = vector.load %arg3[%c0_4, %c0_5] : memref<128x128xbf16, #tpu.memory_space<vmem>>, vector<128x128xbf16>
    %c0_6 = arith.constant 0 : index
    %c0_7 = arith.constant 0 : index
    %5 = vector.load %arg5[%c0_6, %c0_7] : memref<128x128xbf16, #tpu.memory_space<vmem>>, vector<128x128xbf16>
    %cst_8 = arith.constant dense<0.000000e+00> : vector<128x128xf32>
    %6 = tpu.matmul %4, %5, %cst_8 {dimension_numbers = #tpu.dot_dimension_numbers<[1], [0], [0], [1], [0, 0, 1, 1], [], []>} : vector<128x128xbf16>, vector<128x128xbf16>, vector<128x128xf32> -> vector<128x128xf32>
    %7 = arith.mulf %3, %3 : vector<128x128xf32>
    %cst_9 = arith.constant dense<0.000000e+00> : vector<128xf32>
    %8 = vector.multi_reduction <add>, %7, %cst_9 [1] : vector<128x128xf32> to vector<128xf32>
    %9 = vector.shape_cast %8 : vector<128xf32> to vector<128x1xf32>
    %cst_10 = arith.constant 9.99999996E-13 : f32
    %10 = vector.broadcast %cst_10 : f32 to vector<128x1xf32>
    %11 = arith.maximumf %9, %10 : vector<128x1xf32>
    %12 = math.rsqrt %11 : vector<128x1xf32>
    %13 = vector.broadcast %12 : vector<128x1xf32> to vector<128x128xf32>
    %14 = arith.mulf %3, %13 : vector<128x128xf32>
    %15 = arith.mulf %6, %6 : vector<128x128xf32>
    %cst_11 = arith.constant dense<0.000000e+00> : vector<128xf32>
    %16 = vector.multi_reduction <add>, %15, %cst_11 [1] : vector<128x128xf32> to vector<128xf32>
    %17 = vector.shape_cast %16 : vector<128xf32> to vector<128x1xf32>
    %cst_12 = arith.constant 9.99999996E-13 : f32
    %18 = vector.broadcast %cst_12 : f32 to vector<128x1xf32>
    %19 = arith.maximumf %17, %18 : vector<128x1xf32>
    %20 = math.rsqrt %19 : vector<128x1xf32>
    %21 = vector.broadcast %20 : vector<128x1xf32> to vector<128x128xf32>
    %22 = arith.mulf %6, %21 : vector<128x128xf32>
    %23 = vector.broadcast %0 : f32 to vector<128x128xf32>
    %24 = arith.mulf %14, %23 : vector<128x128xf32>
    %25 = arith.truncf %24 : vector<128x128xf32> to vector<128x128xbf16>
    %c0_13 = arith.constant 0 : index
    %c0_14 = arith.constant 0 : index
    %26 = vector.load %arg6[%c0_13, %c0_14] : memref<128x128xbf16, #tpu.memory_space<vmem>>, vector<128x128xbf16>
    tpu.vector_store %arg6[%c0_13, %c0_14], %25 {strides = array<i32>} : memref<128x128xbf16, #tpu.memory_space<vmem>>, vector<128x128xbf16>,
    %27 = tpu.transpose %22, [1, 0] : vector<128x128xf32> -> vector<128x128xf32>
    %28 = arith.truncf %27 : vector<128x128xf32> to vector<128x128xbf16>
    %c0_15 = arith.constant 0 : index
    %c0_16 = arith.constant 0 : index
    %29 = vector.load %arg7[%c0_15, %c0_16] : memref<128x128xbf16, #tpu.memory_space<vmem>>, vector<128x128xbf16>
    tpu.vector_store %arg7[%c0_15, %c0_16], %28 {strides = array<i32>} : memref<128x128xbf16, #tpu.memory_space<vmem>>, vector<128x128xbf16>,
    return
  }
  func.func @transform_0(%arg0: i32) -> i32 {
    %c0_i32 = arith.constant 0 : i32
    %c0_i32_0 = arith.constant 0 : i32
    return %c0_i32 : i32
  }
  func.func @transform_1(%arg0: i32) -> (i32, i32) {
    %c0_i32 = arith.constant 0 : i32
    %c0_i32_0 = arith.constant 0 : i32
    return %arg0, %c0_i32 : i32, i32
  }
  func.func @transform_2(%arg0: i32) -> (i32, i32) {
    %c0_i32 = arith.constant 0 : i32
    %c0_i32_0 = arith.constant 0 : i32
    return %arg0, %c0_i32 : i32, i32
  }
  func.func @transform_3(%arg0: i32) -> (i32, i32) {
    %c0_i32 = arith.constant 0 : i32
    %c0_i32_0 = arith.constant 0 : i32
    %c0_i32_1 = arith.constant 0 : i32
    return %c0_i32, %c0_i32_0 : i32, i32
  }
  func.func @transform_4(%arg0: i32) -> (i32, i32) {
    %c0_i32 = arith.constant 0 : i32
    %c0_i32_0 = arith.constant 0 : i32
    %c0_i32_1 = arith.constant 0 : i32
    return %c0_i32, %c0_i32_0 : i32, i32
  }
  func.func @transform_5(%arg0: i32) -> (i32, i32) {
    %c0_i32 = arith.constant 0 : i32
    %c0_i32_0 = arith.constant 0 : i32
    return %arg0, %c0_i32 : i32, i32
  }
  func.func @transform_6(%arg0: i32) -> (i32, i32) {
    %c0_i32 = arith.constant 0 : i32
    %c0_i32_0 = arith.constant 0 : i32
    return %c0_i32, %arg0 : i32, i32
  }
}

module attributes {stable_mosaic.version = 11 : i64} {
  func.func @_logits_loss_kernel(%arg0: i32, %arg1: i32, %arg2: memref<128x128xbf16, #tpu.memory_space<vmem>>, %arg3: memref<128x128xbf16, #tpu.memory_space<vmem>>, %arg4: memref<128x128xf32, #tpu.memory_space<vmem>>, %arg5: memref<1x1xf32, #tpu.memory_space<vmem>>, %arg6: memref<128x1xf32, #tpu.memory_space<vmem>>, %arg7: memref<128x1xf32, #tpu.memory_space<vmem>>, %arg8: memref<1x1x128xf32, #tpu.memory_space<vmem>>, %arg9: memref<1x1x128xf32, #tpu.memory_space<vmem>>, %arg10: memref<1x1xf32, #tpu.memory_space<vmem>>, %arg11: memref<1x1xf32, #tpu.memory_space<vmem>>, %arg12: memref<1x1xf32, #tpu.memory_space<vmem>>) attributes {dimension_semantics = [#tpu.dimension_semantics<arbitrary>, #tpu.dimension_semantics<arbitrary>], iteration_bounds = array<i64: 1, 1>, scalar_prefetch = 0 : i64, scratch_operands = 7 : i64, tpu.core_type = #tpu.core_type<tc>, window_params = [{transform_indices = @transform_0, window_bounds = array<i64: 128, 128>}, {transform_indices = @transform_1, window_bounds = array<i64: 128, 128>}, {transform_indices = @transform_2, window_bounds = array<i64: 128, 128>}, {pipeline_mode = #tpu.pipeline_mode<synchronous>, transform_indices = @transform_3, window_bounds = array<i64: 1, 1>}]} {
    %c0 = arith.constant 0 : index
    %c0_0 = arith.constant 0 : index
    %0 = vector.load %arg2[%c0, %c0_0] : memref<128x128xbf16, #tpu.memory_space<vmem>>, vector<128x128xbf16>
    %c0_1 = arith.constant 0 : index
    %c0_2 = arith.constant 0 : index
    %1 = vector.load %arg3[%c0_1, %c0_2] : memref<128x128xbf16, #tpu.memory_space<vmem>>, vector<128x128xbf16>
    %cst = arith.constant dense<0.000000e+00> : vector<128x128xf32>
    %2 = tpu.matmul %0, %1, %cst {dimension_numbers = #tpu.dot_dimension_numbers<[1], [0], [0], [1], [0, 0, 1, 1], [], []>} : vector<128x128xbf16>, vector<128x128xbf16>, vector<128x128xf32> -> vector<128x128xf32>
    %c0_3 = arith.constant 0 : index
    %c0_4 = arith.constant 0 : index
    %3 = vector.load %arg4[%c0_3, %c0_4] : memref<128x128xf32, #tpu.memory_space<vmem>>, vector<128x128xf32>
    tpu.vector_store %arg4[%c0_3, %c0_4], %2 {strides = array<i32>} : memref<128x128xf32, #tpu.memory_space<vmem>>, vector<128x128xf32>,
    %c128_i32 = arith.constant 128 : i32
    %4 = arith.muli %arg0, %c128_i32 : i32
    %5 = tpu.iota {dimensions = array<i32: 0>} : vector<128x1xi32>
    %6 = vector.broadcast %4 : i32 to vector<128x1xi32>
    %7 = arith.addi %6, %5 : vector<128x1xi32>
    %c128_i32_5 = arith.constant 128 : i32
    %8 = arith.muli %arg1, %c128_i32_5 : i32
    %9 = tpu.iota {dimensions = array<i32: 1>} : vector<1x128xi32>
    %10 = vector.broadcast %8 : i32 to vector<1x128xi32>
    %11 = arith.addi %10, %9 : vector<1x128xi32>
    %c8_i32 = arith.constant 8 : i32
    %12 = vector.broadcast %c8_i32 : i32 to vector<128x1xi32>
    %13 = arith.cmpi slt, %7, %12 : vector<128x1xi32>
    %c8_i32_6 = arith.constant 8 : i32
    %14 = vector.broadcast %c8_i32_6 : i32 to vector<1x128xi32>
    %15 = arith.cmpi slt, %11, %14 : vector<1x128xi32>
    %c0_i32 = arith.constant 0 : i32
    %16 = arith.cmpi eq, %arg0, %c0_i32 : i32
    %c0_i32_7 = arith.constant 0 : i32
    %17 = arith.cmpi eq, %arg1, %c0_i32_7 : i32
    %18 = arith.andi %16, %17 : i1
    %19 = arith.extui %18 : i1 to i32
    %c0_i32_8 = arith.constant 0 : i32
    %20 = arith.cmpi ne, %19, %c0_i32_8 : i32
    scf.if %20 {
      %cst_43 = arith.constant 0.000000e+00 : f32
      %91 = vector.broadcast %cst_43 : f32 to vector<1x1xf32>
      %c0_44 = arith.constant 0 : index
      %c0_45 = arith.constant 0 : index
      %92 = vector.load %arg10[%c0_44, %c0_45] : memref<1x1xf32, #tpu.memory_space<vmem>>, vector<1x1xf32>
      tpu.vector_store %arg10[%c0_44, %c0_45], %91 {strides = array<i32>} : memref<1x1xf32, #tpu.memory_space<vmem>>, vector<1x1xf32>,
      %cst_46 = arith.constant 0.000000e+00 : f32
      %93 = vector.broadcast %cst_46 : f32 to vector<1x1xf32>
      %c0_47 = arith.constant 0 : index
      %c0_48 = arith.constant 0 : index
      %94 = vector.load %arg11[%c0_47, %c0_48] : memref<1x1xf32, #tpu.memory_space<vmem>>, vector<1x1xf32>
      tpu.vector_store %arg11[%c0_47, %c0_48], %93 {strides = array<i32>} : memref<1x1xf32, #tpu.memory_space<vmem>>, vector<1x1xf32>,
      %cst_49 = arith.constant 0.000000e+00 : f32
      %95 = vector.broadcast %cst_49 : f32 to vector<1x1xf32>
      %c0_50 = arith.constant 0 : index
      %c0_51 = arith.constant 0 : index
      %96 = vector.load %arg12[%c0_50, %c0_51] : memref<1x1xf32, #tpu.memory_space<vmem>>, vector<1x1xf32>
      tpu.vector_store %arg12[%c0_50, %c0_51], %95 {strides = array<i32>} : memref<1x1xf32, #tpu.memory_space<vmem>>, vector<1x1xf32>,
    } else {
    }
    %cst_9 = arith.constant -1.000000e+30 : f32
    %21 = vector.shape_cast %15 : vector<1x128xi1> to vector<1x128xi1>
    %22 = vector.broadcast %21 : vector<1x128xi1> to vector<128x128xi1>
    %23 = vector.broadcast %cst_9 : f32 to vector<128x128xf32>
    %24 = arith.select %22, %2, %23 : vector<128x128xi1>, vector<128x128xf32>
    %c0_i32_10 = arith.constant 0 : i32
    %25 = arith.cmpi eq, %arg1, %c0_i32_10 : i32
    %26 = arith.extui %25 : i1 to i32
    %c0_i32_11 = arith.constant 0 : i32
    %27 = arith.cmpi ne, %26, %c0_i32_11 : i32
    scf.if %27 {
      %cst_43 = arith.constant -1.000000e+30 : f32
      %91 = vector.broadcast %cst_43 : f32 to vector<128x1xf32>
      %c0_44 = arith.constant 0 : index
      %c0_45 = arith.constant 0 : index
      %92 = vector.load %arg6[%c0_44, %c0_45] : memref<128x1xf32, #tpu.memory_space<vmem>>, vector<128x1xf32>
      tpu.vector_store %arg6[%c0_44, %c0_45], %91 {strides = array<i32>} : memref<128x1xf32, #tpu.memory_space<vmem>>, vector<128x1xf32>,
      %cst_46 = arith.constant 0.000000e+00 : f32
      %93 = vector.broadcast %cst_46 : f32 to vector<128x1xf32>
      %c0_47 = arith.constant 0 : index
      %c0_48 = arith.constant 0 : index
      %94 = vector.load %arg7[%c0_47, %c0_48] : memref<128x1xf32, #tpu.memory_space<vmem>>, vector<128x1xf32>
      tpu.vector_store %arg7[%c0_47, %c0_48], %93 {strides = array<i32>} : memref<128x1xf32, #tpu.memory_space<vmem>>, vector<128x1xf32>,
    } else {
    }
    %c0_12 = arith.constant 0 : index
    %c0_13 = arith.constant 0 : index
    %28 = vector.load %arg6[%c0_12, %c0_13] : memref<128x1xf32, #tpu.memory_space<vmem>>, vector<128x1xf32>
    %cst_14 = arith.constant dense<0xFF800000> : vector<128xf32>
    %29 = vector.multi_reduction <maximumf>, %24, %cst_14 [1] : vector<128x128xf32> to vector<128xf32>
    %30 = vector.shape_cast %29 : vector<128xf32> to vector<128x1xf32>
    %31 = arith.maximumf %28, %30 : vector<128x1xf32>
    %c0_15 = arith.constant 0 : index
    %c0_16 = arith.constant 0 : index
    %32 = vector.load %arg7[%c0_15, %c0_16] : memref<128x1xf32, #tpu.memory_space<vmem>>, vector<128x1xf32>
    %33 = arith.subf %28, %31 : vector<128x1xf32>
    %34 = math.exp %33 : vector<128x1xf32>
    %35 = arith.mulf %32, %34 : vector<128x1xf32>
    %36 = vector.broadcast %31 : vector<128x1xf32> to vector<128x128xf32>
    %37 = arith.subf %24, %36 : vector<128x128xf32>
    %38 = math.exp %37 : vector<128x128xf32>
    %cst_17 = arith.constant dense<0.000000e+00> : vector<128xf32>
    %39 = vector.multi_reduction <add>, %38, %cst_17 [1] : vector<128x128xf32> to vector<128xf32>
    %40 = vector.shape_cast %39 : vector<128xf32> to vector<128x1xf32>
    %41 = arith.addf %35, %40 : vector<128x1xf32>
    %c0_18 = arith.constant 0 : index
    %c0_19 = arith.constant 0 : index
    %42 = vector.load %arg7[%c0_18, %c0_19] : memref<128x1xf32, #tpu.memory_space<vmem>>, vector<128x1xf32>
    tpu.vector_store %arg7[%c0_18, %c0_19], %41 {strides = array<i32>} : memref<128x1xf32, #tpu.memory_space<vmem>>, vector<128x1xf32>,
    %c0_20 = arith.constant 0 : index
    %c0_21 = arith.constant 0 : index
    %43 = vector.load %arg6[%c0_20, %c0_21] : memref<128x1xf32, #tpu.memory_space<vmem>>, vector<128x1xf32>
    tpu.vector_store %arg6[%c0_20, %c0_21], %31 {strides = array<i32>} : memref<128x1xf32, #tpu.memory_space<vmem>>, vector<128x1xf32>,
    %cst_22 = arith.constant -1.000000e+30 : f32
    %44 = vector.shape_cast %13 : vector<128x1xi1> to vector<128x1xi1>
    %45 = vector.broadcast %44 : vector<128x1xi1> to vector<128x128xi1>
    %46 = vector.broadcast %cst_22 : f32 to vector<128x128xf32>
    %47 = arith.select %45, %2, %46 : vector<128x128xi1>, vector<128x128xf32>
    %c0_i32_23 = arith.constant 0 : i32
    %48 = arith.cmpi eq, %arg0, %c0_i32_23 : i32
    %49 = arith.extui %48 : i1 to i32
    %c0_i32_24 = arith.constant 0 : i32
    %50 = arith.cmpi ne, %49, %c0_i32_24 : i32
    scf.if %50 {
      %cst_43 = arith.constant -1.000000e+30 : f32
      %91 = vector.broadcast %cst_43 : f32 to vector<1x128xf32>
      %92 = arith.index_cast %arg1 : i32 to index
      %c0_44 = arith.constant 0 : index
      %c0_45 = arith.constant 0 : index
      %93 = vector.load %arg8[%92, %c0_44, %c0_45] : memref<1x1x128xf32, #tpu.memory_space<vmem>>, vector<1x1x128xf32>
      %94 = vector.shape_cast %93 : vector<1x1x128xf32> to vector<1x128xf32>
      %95 = vector.shape_cast %91 : vector<1x128xf32> to vector<1x1x128xf32>
      tpu.vector_store %arg8[%92, %c0_44, %c0_45], %95 {strides = array<i32>} : memref<1x1x128xf32, #tpu.memory_space<vmem>>, vector<1x1x128xf32>,
      %cst_46 = arith.constant 0.000000e+00 : f32
      %96 = vector.broadcast %cst_46 : f32 to vector<1x128xf32>
      %97 = arith.index_cast %arg1 : i32 to index
      %c0_47 = arith.constant 0 : index
      %c0_48 = arith.constant 0 : index
      %98 = vector.load %arg9[%97, %c0_47, %c0_48] : memref<1x1x128xf32, #tpu.memory_space<vmem>>, vector<1x1x128xf32>
      %99 = vector.shape_cast %98 : vector<1x1x128xf32> to vector<1x128xf32>
      %100 = vector.shape_cast %96 : vector<1x128xf32> to vector<1x1x128xf32>
      tpu.vector_store %arg9[%97, %c0_47, %c0_48], %100 {strides = array<i32>} : memref<1x1x128xf32, #tpu.memory_space<vmem>>, vector<1x1x128xf32>,
    } else {
    }
    %51 = arith.index_cast %arg1 : i32 to index
    %c0_25 = arith.constant 0 : index
    %c0_26 = arith.constant 0 : index
    %52 = vector.load %arg8[%51, %c0_25, %c0_26] : memref<1x1x128xf32, #tpu.memory_space<vmem>>, vector<1x1x128xf32>
    %53 = vector.shape_cast %52 : vector<1x1x128xf32> to vector<1x128xf32>
    %cst_27 = arith.constant dense<0xFF800000> : vector<128xf32>
    %54 = vector.multi_reduction <maximumf>, %47, %cst_27 [0] : vector<128x128xf32> to vector<128xf32>
    %55 = vector.shape_cast %54 : vector<128xf32> to vector<1x128xf32>
    %56 = arith.maximumf %53, %55 : vector<1x128xf32>
    %57 = arith.index_cast %arg1 : i32 to index
    %c0_28 = arith.constant 0 : index
    %c0_29 = arith.constant 0 : index
    %58 = vector.load %arg9[%57, %c0_28, %c0_29] : memref<1x1x128xf32, #tpu.memory_space<vmem>>, vector<1x1x128xf32>
    %59 = vector.shape_cast %58 : vector<1x1x128xf32> to vector<1x128xf32>
    %60 = arith.subf %53, %56 : vector<1x128xf32>
    %61 = math.exp %60 : vector<1x128xf32>
    %62 = arith.mulf %59, %61 : vector<1x128xf32>
    %63 = vector.broadcast %56 : vector<1x128xf32> to vector<128x128xf32>
    %64 = arith.subf %47, %63 : vector<128x128xf32>
    %65 = math.exp %64 : vector<128x128xf32>
    %cst_30 = arith.constant dense<0.000000e+00> : vector<128xf32>
    %66 = vector.multi_reduction <add>, %65, %cst_30 [0] : vector<128x128xf32> to vector<128xf32>
    %67 = vector.shape_cast %66 : vector<128xf32> to vector<1x128xf32>
    %68 = arith.addf %62, %67 : vector<1x128xf32>
    %69 = arith.index_cast %arg1 : i32 to index
    %c0_31 = arith.constant 0 : index
    %c0_32 = arith.constant 0 : index
    %70 = vector.load %arg9[%69, %c0_31, %c0_32] : memref<1x1x128xf32, #tpu.memory_space<vmem>>, vector<1x1x128xf32>
    %71 = vector.shape_cast %70 : vector<1x1x128xf32> to vector<1x128xf32>
    %72 = vector.shape_cast %68 : vector<1x128xf32> to vector<1x1x128xf32>
    tpu.vector_store %arg9[%69, %c0_31, %c0_32], %72 {strides = array<i32>} : memref<1x1x128xf32, #tpu.memory_space<vmem>>, vector<1x1x128xf32>,
    %73 = arith.index_cast %arg1 : i32 to index
    %c0_33 = arith.constant 0 : index
    %c0_34 = arith.constant 0 : index
    %74 = vector.load %arg8[%73, %c0_33, %c0_34] : memref<1x1x128xf32, #tpu.memory_space<vmem>>, vector<1x1x128xf32>
    %75 = vector.shape_cast %74 : vector<1x1x128xf32> to vector<1x128xf32>
    %76 = vector.shape_cast %56 : vector<1x128xf32> to vector<1x1x128xf32>
    tpu.vector_store %arg8[%73, %c0_33, %c0_34], %76 {strides = array<i32>} : memref<1x1x128xf32, #tpu.memory_space<vmem>>, vector<1x1x128xf32>,
    %77 = arith.cmpi eq, %arg0, %arg1 : i32
    %78 = arith.extui %77 : i1 to i32
    %c0_i32_35 = arith.constant 0 : i32
    %79 = arith.cmpi ne, %78, %c0_i32_35 : i32
    scf.if %79 {
      %91 = tpu.iota {dimensions = array<i32: 0>} : vector<128x128xi32>
      %92 = tpu.iota {dimensions = array<i32: 1>} : vector<128x128xi32>
      %93 = arith.cmpi eq, %91, %92 : vector<128x128xi32>
      %94 = vector.broadcast %15 : vector<1x128xi1> to vector<128x128xi1>
      %95 = arith.andi %93, %94 : vector<128x128xi1>
      %c0_43 = arith.constant 0 : index
      %c0_44 = arith.constant 0 : index
      %96 = vector.load %arg12[%c0_43, %c0_44] : memref<1x1xf32, #tpu.memory_space<vmem>>, vector<1x1xf32>
      %cst_45 = arith.constant 0.000000e+00 : f32
      %97 = vector.broadcast %cst_45 : f32 to vector<128x128xf32>
      %98 = arith.select %95, %2, %97 : vector<128x128xi1>, vector<128x128xf32>
      %99 = vector.shape_cast %98 : vector<128x128xf32> to vector<1x128x128xf32>
      %cst_46 = arith.constant dense<0.000000e+00> : vector<1xf32>
      %100 = vector.multi_reduction <add>, %99, %cst_46 [1, 2] : vector<1x128x128xf32> to vector<1xf32>
      %101 = vector.shape_cast %100 : vector<1xf32> to vector<1x1x1xf32>
      %102 = vector.extract %101[0, 0, 0] : f32 from vector<1x1x1xf32>
      %103 = vector.broadcast %102 : f32 to vector<1x1xf32>
      %104 = arith.addf %96, %103 : vector<1x1xf32>
      %c0_47 = arith.constant 0 : index
      %c0_48 = arith.constant 0 : index
      %105 = vector.load %arg12[%c0_47, %c0_48] : memref<1x1xf32, #tpu.memory_space<vmem>>, vector<1x1xf32>
      tpu.vector_store %arg12[%c0_47, %c0_48], %104 {strides = array<i32>} : memref<1x1xf32, #tpu.memory_space<vmem>>, vector<1x1xf32>,
    } else {
    }
    %c0_i32_36 = arith.constant 0 : i32
    %80 = arith.cmpi eq, %arg1, %c0_i32_36 : i32
    %81 = arith.extui %80 : i1 to i32
    %c0_i32_37 = arith.constant 0 : i32
    %82 = arith.cmpi ne, %81, %c0_i32_37 : i32
    scf.if %82 {
      %c0_43 = arith.constant 0 : index
      %c0_44 = arith.constant 0 : index
      %91 = vector.load %arg6[%c0_43, %c0_44] : memref<128x1xf32, #tpu.memory_space<vmem>>, vector<128x1xf32>
      %c0_45 = arith.constant 0 : index
      %c0_46 = arith.constant 0 : index
      %92 = vector.load %arg7[%c0_45, %c0_46] : memref<128x1xf32, #tpu.memory_space<vmem>>, vector<128x1xf32>
      %93 = math.log %92 : vector<128x1xf32>
      %94 = arith.addf %91, %93 : vector<128x1xf32>
      %c0_47 = arith.constant 0 : index
      %c0_48 = arith.constant 0 : index
      %95 = vector.load %arg10[%c0_47, %c0_48] : memref<1x1xf32, #tpu.memory_space<vmem>>, vector<1x1xf32>
      %cst_49 = arith.constant 0.000000e+00 : f32
      %96 = vector.broadcast %cst_49 : f32 to vector<128x1xf32>
      %97 = arith.select %13, %94, %96 : vector<128x1xi1>, vector<128x1xf32>
      %98 = vector.shape_cast %97 : vector<128x1xf32> to vector<1x128x1xf32>
      %cst_50 = arith.constant dense<0.000000e+00> : vector<1xf32>
      %99 = vector.multi_reduction <add>, %98, %cst_50 [1, 2] : vector<1x128x1xf32> to vector<1xf32>
      %100 = vector.shape_cast %99 : vector<1xf32> to vector<1x1x1xf32>
      %101 = vector.extract %100[0, 0, 0] : f32 from vector<1x1x1xf32>
      %102 = vector.broadcast %101 : f32 to vector<1x1xf32>
      %103 = arith.addf %95, %102 : vector<1x1xf32>
      %c0_51 = arith.constant 0 : index
      %c0_52 = arith.constant 0 : index
      %104 = vector.load %arg10[%c0_51, %c0_52] : memref<1x1xf32, #tpu.memory_space<vmem>>, vector<1x1xf32>
      tpu.vector_store %arg10[%c0_51, %c0_52], %103 {strides = array<i32>} : memref<1x1xf32, #tpu.memory_space<vmem>>, vector<1x1xf32>,
    } else {
    }
    %c0_i32_38 = arith.constant 0 : i32
    %83 = arith.cmpi eq, %arg0, %c0_i32_38 : i32
    %84 = arith.extui %83 : i1 to i32
    %c0_i32_39 = arith.constant 0 : i32
    %85 = arith.cmpi ne, %84, %c0_i32_39 : i32
    scf.if %85 {
      %91 = arith.index_cast %arg1 : i32 to index
      %c0_43 = arith.constant 0 : index
      %c0_44 = arith.constant 0 : index
      %92 = vector.load %arg8[%91, %c0_43, %c0_44] : memref<1x1x128xf32, #tpu.memory_space<vmem>>, vector<1x1x128xf32>
      %93 = vector.shape_cast %92 : vector<1x1x128xf32> to vector<1x128xf32>
      %94 = arith.index_cast %arg1 : i32 to index
      %c0_45 = arith.constant 0 : index
      %c0_46 = arith.constant 0 : index
      %95 = vector.load %arg9[%94, %c0_45, %c0_46] : memref<1x1x128xf32, #tpu.memory_space<vmem>>, vector<1x1x128xf32>
      %96 = vector.shape_cast %95 : vector<1x1x128xf32> to vector<1x128xf32>
      %97 = math.log %96 : vector<1x128xf32>
      %98 = arith.addf %93, %97 : vector<1x128xf32>
      %c0_47 = arith.constant 0 : index
      %c0_48 = arith.constant 0 : index
      %99 = vector.load %arg11[%c0_47, %c0_48] : memref<1x1xf32, #tpu.memory_space<vmem>>, vector<1x1xf32>
      %cst_49 = arith.constant 0.000000e+00 : f32
      %100 = vector.broadcast %cst_49 : f32 to vector<1x128xf32>
      %101 = arith.select %15, %98, %100 : vector<1x128xi1>, vector<1x128xf32>
      %102 = vector.shape_cast %101 : vector<1x128xf32> to vector<1x1x128xf32>
      %cst_50 = arith.constant dense<0.000000e+00> : vector<1xf32>
      %103 = vector.multi_reduction <add>, %102, %cst_50 [1, 2] : vector<1x1x128xf32> to vector<1xf32>
      %104 = vector.shape_cast %103 : vector<1xf32> to vector<1x1x1xf32>
      %105 = vector.extract %104[0, 0, 0] : f32 from vector<1x1x1xf32>
      %106 = vector.broadcast %105 : f32 to vector<1x1xf32>
      %107 = arith.addf %99, %106 : vector<1x1xf32>
      %c0_51 = arith.constant 0 : index
      %c0_52 = arith.constant 0 : index
      %108 = vector.load %arg11[%c0_51, %c0_52] : memref<1x1xf32, #tpu.memory_space<vmem>>, vector<1x1xf32>
      tpu.vector_store %arg11[%c0_51, %c0_52], %107 {strides = array<i32>} : memref<1x1xf32, #tpu.memory_space<vmem>>, vector<1x1xf32>,
    } else {
    }
    %c0_i32_40 = arith.constant 0 : i32
    %86 = arith.cmpi eq, %arg0, %c0_i32_40 : i32
    %c0_i32_41 = arith.constant 0 : i32
    %87 = arith.cmpi eq, %arg1, %c0_i32_41 : i32
    %88 = arith.andi %86, %87 : i1
    %89 = arith.extui %88 : i1 to i32
    %c0_i32_42 = arith.constant 0 : i32
    %90 = arith.cmpi ne, %89, %c0_i32_42 : i32
    scf.if %90 {
      %c0_43 = arith.constant 0 : index
      %c0_44 = arith.constant 0 : index
      %91 = vector.load %arg10[%c0_43, %c0_44] : memref<1x1xf32, #tpu.memory_space<vmem>>, vector<1x1xf32>
      %c0_45 = arith.constant 0 : index
      %c0_46 = arith.constant 0 : index
      %92 = vector.load %arg11[%c0_45, %c0_46] : memref<1x1xf32, #tpu.memory_space<vmem>>, vector<1x1xf32>
      %93 = arith.addf %91, %92 : vector<1x1xf32>
      %c0_47 = arith.constant 0 : index
      %c0_48 = arith.constant 0 : index
      %94 = vector.load %arg12[%c0_47, %c0_48] : memref<1x1xf32, #tpu.memory_space<vmem>>, vector<1x1xf32>
      %cst_49 = arith.constant 2.000000e+00 : f32
      %95 = vector.broadcast %cst_49 : f32 to vector<1x1xf32>
      %96 = arith.mulf %95, %94 : vector<1x1xf32>
      %97 = arith.subf %93, %96 : vector<1x1xf32>
      %cst_50 = arith.constant 6.250000e-02 : f32
      %98 = vector.broadcast %cst_50 : f32 to vector<1x1xf32>
      %99 = arith.mulf %98, %97 : vector<1x1xf32>
      %c0_51 = arith.constant 0 : index
      %c0_52 = arith.constant 0 : index
      %100 = vector.load %arg5[%c0_51, %c0_52] : memref<1x1xf32, #tpu.memory_space<vmem>>, vector<1x1xf32>
      tpu.vector_store %arg5[%c0_51, %c0_52], %99 {strides = array<i32>} : memref<1x1xf32, #tpu.memory_space<vmem>>, vector<1x1xf32>,
    } else {
    }
    return
  }
  func.func @transform_0(%arg0: i32, %arg1: i32) -> (i32, i32) {
    %c0_i32 = arith.constant 0 : i32
    %c0_i32_0 = arith.constant 0 : i32
    return %arg0, %c0_i32 : i32, i32
  }
  func.func @transform_1(%arg0: i32, %arg1: i32) -> (i32, i32) {
    %c0_i32 = arith.constant 0 : i32
    %c0_i32_0 = arith.constant 0 : i32
    return %c0_i32, %arg1 : i32, i32
  }
  func.func @transform_2(%arg0: i32, %arg1: i32) -> (i32, i32) {
    %c0_i32 = arith.constant 0 : i32
    return %arg0, %arg1 : i32, i32
  }
  func.func @transform_3(%arg0: i32, %arg1: i32) -> (i32, i32) {
    %c0_i32 = arith.constant 0 : i32
    %c0_i32_0 = arith.constant 0 : i32
    %c0_i32_1 = arith.constant 0 : i32
    return %c0_i32, %c0_i32_0 : i32, i32
  }
}

</mosaic_0001>

<bundles_post_ra>
// kernel: muscall_forward.2
= control target key start
LH: loop header
LB: loop body
LE: loop exit
PB: predicated region body
PF: predicated region fallthrough
CT: control target
= control target key end

     0   :  { %s1635_s4 = inlined_call_operand.vmem [shape: bf16[128,128], index: 4, kind: input, shape index: {}]   ;;  %s1636_s2 = inlined_call_operand.vmem [shape: bf16[128,128], index: 2, kind: input, shape index: {}]   ;;  %s1637_s3 = inlined_call_operand.vmem [shape: bf16[128,128], index: 3, kind: input, shape index: {}]   ;;  %s1638_s1 = inlined_call_operand.vmem [shape: bf16[128,128], index: 1, kind: input, shape index: {}]   ;;  %s1639_s0 = inlined_call_operand.<no memory space> [shape: f32[1], index: 0, kind: input, shape index: {}]   ;;  %s1640_s5 = inlined_call_operand.vmem [shape: bf16[128,128], index: 5, kind: output, shape index: {0}]   ;;  %s1641_s6 = inlined_call_operand.vmem [shape: bf16[128,128], index: 6, kind: output, shape index: {1}]  }
   0x1   :  { %v1170_v0 = vld [vmem:[%s1635_s4] sm:$0xff]   ;;  %v1171_v1 = vld [vmem:[%s1635_s4 + $0x8] sm:$0xff]   ;;  %v1172_v2 = vld [vmem:[%s1635_s4 + $0x10] sm:$0xff]  }
   0x2   :  { %1138 = vmatprep.subr.bf16.mxu1 %v1170_v0  ;;  %v1173_v3 = vld [vmem:[%s1635_s4 + $0x18] sm:$0xff]   ;;  %v1178_v4 = vld [vmem:[%s1636_s2] sm:$0xff]   ;;  %v1181_v6 = vld [vmem:[%s1637_s3 + $0x8] sm:$0xff]  }
   0x3   :  { %1139 = vmatpush3.bf16.msra.mxu1 %v1170_v0  ;;  %v1179_v5 = vld [vmem:[%s1637_s3] sm:$0xff]   ;;  %1154 = vmatprep.mubr.bf16.mxu1 %v1178_v4  ;;  %v1183_v8 = vld [vmem:[%s1637_s3 + $0x10] sm:$0xff]   ;;  %v1175_v9 = vld [vmem:[%s1635_s4 + $0x28] sm:$0xff]  }
   0x4   :  { %1140 = vmatprep.subr.bf16.mxu1 %v1171_v1  ;;  %1106 = vmatprep.subr.bf16.mxu0 %v1179_v5  ;;  %v1174_v7 = vld [vmem:[%s1635_s4 + $0x20] sm:$0xff]   ;;  %v1185_v10 = vld [vmem:[%s1637_s3 + $0x18] sm:$0xff]   ;;  %v1176_v11 = vld [vmem:[%s1635_s4 + $0x30] sm:$0xff]  }
   0x5   :  { %1107 = vmatpush3.bf16.msra.mxu0 %v1179_v5  ;;  %v1187_v12 = vld [vmem:[%s1637_s3 + $0x20] sm:$0xff]   ;;  %v1177_v13 = vld [vmem:[%s1635_s4 + $0x38] sm:$0xff]   ;;  %v1189_v15 = vld [vmem:[%s1637_s3 + $0x28] sm:$0xff]  }
   0x6   :  { %1108 = vmatprep.subr.bf16.mxu0 %v1181_v6  ;;  %v1194_v14 = vld [vmem:[%s1638_s1] sm:$0xff]   ;;  %v1191_v16 = vld [vmem:[%s1637_s3 + $0x30] sm:$0xff]   ;;  %v1180_v17 = vld [vmem:[%s1636_s2 + $0x8] sm:$0xff]  }
   0x7   :  { %1141 = vmatpush3.bf16.msra.mxu1 %v1171_v1  ;;  %1122 = vmatprep.mubr.bf16.mxu0 %v1194_v14  ;;  %v1182_v18 = vld [vmem:[%s1636_s2 + $0x10] sm:$0xff]   ;;  %v1193_v19 = vld [vmem:[%s1637_s3 + $0x38] sm:$0xff]   ;;  %v1186_v21 = vld [vmem:[%s1636_s2 + $0x20] sm:$0xff]  }
   0x8   :  { %1142 = vmatprep.subr.bf16.mxu1 %v1172_v2  ;;  %v1184_v20 = vld [vmem:[%s1636_s2 + $0x18] sm:$0xff]   ;;  %v1195_v22 = vld [vmem:[%s1638_s1 + $0x8] sm:$0xff]   ;;  %v1196_v23 = vld [vmem:[%s1638_s1 + $0x10] sm:$0xff]  }
   0x9   :  { %1109 = vmatpush3.bf16.msra.mxu0 %v1181_v6  ;;  %v1188_v24 = vld [vmem:[%s1636_s2 + $0x28] sm:$0xff]   ;;  %v1190_v25 = vld [vmem:[%s1636_s2 + $0x30] sm:$0xff]   ;;  %v1197_v26 = vld [vmem:[%s1638_s1 + $0x18] sm:$0xff]  }
   0xa   :  { %1110 = vmatprep.subr.bf16.mxu0 %v1183_v8  ;;  %v1198_v27 = vld [vmem:[%s1638_s1 + $0x20] sm:$0xff]   ;;  %v1192_v28 = vld [vmem:[%s1636_s2 + $0x38] sm:$0xff]   ;;  %v1199_v29 = vld [vmem:[%s1638_s1 + $0x28] sm:$0xff]  }
   0xb   :  { %1143 = vmatpush3.bf16.msra.mxu1 %v1172_v2  ;;  %v1200_v30 = vld [vmem:[%s1638_s1 + $0x30] sm:$0xff]   ;;  %v1201_v31 = vld [vmem:[%s1638_s1 + $0x38] sm:$0xff]  }
   0xc   :  { %1144 = vmatprep.subr.bf16.mxu1 %v1173_v3 }
   0xd   :  { %1111 = vmatpush3.bf16.msra.mxu0 %v1183_v8 }
   0xe   :  { %1112 = vmatprep.subr.bf16.mxu0 %v1185_v10 }
   0xf   :  { %1145 = vmatpush3.bf16.msra.mxu1 %v1173_v3 }
  0x10   :  { %1146 = vmatprep.subr.bf16.mxu1 %v1174_v7 }
  0x11   :  { %1113 = vmatpush3.bf16.msra.mxu0 %v1185_v10 }
  0x12   :  { %1114 = vmatprep.subr.bf16.mxu0 %v1187_v12 }
  0x13   :  { %1147 = vmatpush3.bf16.msra.mxu1 %v1174_v7 }
  0x14   :  { %1148 = vmatprep.subr.bf16.mxu1 %v1175_v9 }
  0x15   :  { %1115 = vmatpush3.bf16.msra.mxu0 %v1187_v12 }
  0x16   :  { %1116 = vmatprep.subr.bf16.mxu0 %v1189_v15 }
  0x17   :  { %1149 = vmatpush3.bf16.msra.mxu1 %v1175_v9 }
  0x18   :  { %1150 = vmatprep.subr.bf16.mxu1 %v1176_v11 }
  0x19   :  { %1117 = vmatpush3.bf16.msra.mxu0 %v1189_v15 }
  0x1a   :  { %1118 = vmatprep.subr.bf16.mxu0 %v1191_v16 }
  0x1b   :  { %1151 = vmatpush3.bf16.msra.mxu1 %v1176_v11 }
  0x1c   :  { %1152 = vmatprep.subr.bf16.mxu1 %v1177_v13 }
  0x1d   :  { %1119 = vmatpush3.bf16.msra.mxu0 %v1191_v16 }
  0x1e   :  { %1120 = vmatprep.subr.bf16.mxu0 %v1193_v19 }
  0x1f   :  { %1153 = vmatpush3.bf16.msra.mxu1 %v1177_v13 }
  0x21   :  { %1121 = vmatpush3.bf16.msra.mxu0 %v1193_v19 }
  0x22   :  { %1155 = vmatmul.mubr.bf16.vlgmr.msra.gmra.mrb[0].mxu1 %v1180_v17 }
  0x23   :  { %1158 = vmatprep.mubr.bf16.mxu1 %v1182_v18 }
  0x24   :  { %1123 = vmatmul.mubr.bf16.vlgmr.msra.gmra.mrb[0].mxu0 %v1195_v22 }
  0x25   :  { %1126 = vmatprep.mubr.bf16.mxu0 %v1196_v23 }
  0x2a   :  { %1159 = vmatmul.mubr.bf16.gmra.mrb[4].mxu1 %v1184_v20 }
  0x2b   :  { %1162 = vmatprep.mubr.bf16.mxu1 %v1186_v21 }
  0x2c   :  { %1127 = vmatmul.mubr.bf16.gmra.mrb[4].mxu0 %v1197_v26 }
  0x2d   :  { %1130 = vmatprep.mubr.bf16.mxu0 %v1198_v27 }
  0x32   :  { %1163 = vmatmul.mubr.bf16.gmra.mrb[8].mxu1 %v1188_v24 }
  0x33   :  { %1166 = vmatprep.mubr.bf16.mxu1 %v1190_v25 }
  0x34   :  { %1131 = vmatmul.mubr.bf16.gmra.mrb[8].mxu0 %v1199_v29 }
  0x35   :  { %1134 = vmatprep.mubr.bf16.mxu0 %v1200_v30 }
  0x3a   :  { %1167 = vmatmul.mubr.bf16.gmra.mrb[12].mxu1 %v1192_v28 }
  0x3c   :  { %1135 = vmatmul.mubr.bf16.gmra.mrb[12].mxu0 %v1201_v31 }
  0xf5   :  { %v1397_v32 = vpop.f32.mrb[0].mxu1 }
  0xf6   :  { %v1399_v33 = vpop.f32.mrb[1].mxu1  ;;  %v573_v34 = vmul.f32 %v1397_v32, %v1397_v32 }
  0xf7   :  { %v1403_v35 = vpop.f32.mrb[2].mxu1  ;;  %v571_v36 = vmul.f32 %v1399_v33, %v1399_v33  ;;  %v1419_v43 = vpop.f32.mrb[0].mxu0 }
  0xf8   :  { %591 = vadd.xlane.f32.xlu1 %v573_v34  ;;  %v1407_v37 = vpop.f32.mrb[3].mxu1  ;;  %v574_v38 = vmul.f32 %v1403_v35, %v1403_v35  ;;  %v1423_v45 = vpop.f32.mrb[1].mxu0  ;;  %v477_v17 = vmul.f32 %v1419_v43, %v1419_v43 }
  0xf9   :  { %587 = vadd.xlane.f32.xlu0 %v571_v36  ;;  %v572_v39 = vmul.f32 %v1407_v37, %v1407_v37  ;;  %v1427_v47 = vpop.f32.mrb[2].mxu0  ;;  %v475_v12 = vmul.f32 %v1423_v45, %v1423_v45 }
  0xfa   :  { %v1433_v50 = vpop.f32.mrb[3].mxu0  ;;  %v478_v19 = vmul.f32 %v1427_v47, %v1427_v47 }
  0xfb   :  { %v476_v14 = vmul.f32 %v1433_v50, %v1433_v50 }
  0xfc   :  { %593 = vadd.xlane.f32.xlu1 %v574_v38 }
  0xfd   :  { %589 = vadd.xlane.f32.xlu0 %v572_v39  ;;  %v1413_v40 = vpop.f32.mrb[4].mxu1 }
  0xfe   :  { %v1415_v41 = vpop.f32.mrb[5].mxu1  ;;  %v577_v42 = vmul.f32 %v1413_v40, %v1413_v40 }
  0xff   :  { %v1421_v44 = vpop.f32.mrb[6].mxu1  ;;  %v575_v49 = vmul.f32 %v1415_v41, %v1415_v41  ;;  %v1443_v55 = vpop.f32.mrb[4].mxu0 }
 0x100   :  { %v1425_v46 = vpop.f32.mrb[7].mxu1  ;;  %v578_v52 = vmul.f32 %v1421_v44, %v1421_v44  ;;  %v1447_v57 = vpop.f32.mrb[5].mxu0  ;;  %v481_v22 = vmul.f32 %v1443_v55, %v1443_v55 }
 0x101   :  { %599 = vadd.xlane.f32.xlu0 %v577_v42  ;;  %v576_v48 = vmul.f32 %v1425_v46, %v1425_v46  ;;  %v1451_v59 = vpop.f32.mrb[6].mxu0  ;;  %v479_v20 = vmul.f32 %v1447_v57, %v1447_v57 }
 0x102   :  { %v1457_v62 = vpop.f32.mrb[7].mxu0  ;;  %v482_v23 = vmul.f32 %v1451_v59, %v1451_v59 }
 0x103   :  { %597 = vadd.xlane.f32.xlu1 %v576_v48  ;;  %v480_v21 = vmul.f32 %v1457_v62, %v1457_v62 }
 0x105   :  { %595 = vadd.xlane.f32.xlu0 %v575_v49  ;;  %v1435_v51 = vpop.f32.mrb[8].mxu1 }
 0x106   :  { %v1439_v53 = vpop.f32.mrb[9].mxu1  ;;  %v581_v54 = vmul.f32 %v1435_v51, %v1435_v51 }
 0x107   :  { %601 = vadd.xlane.f32.xlu1 %v578_v52  ;;  %v1445_v56 = vpop.f32.mrb[10].mxu1  ;;  %v579_v61 = vmul.f32 %v1439_v53, %v1439_v53  ;;  %v1467_v3 = vpop.f32.mrb[8].mxu0 }
 0x108   :  { %v1449_v58 = vpop.f32.mrb[11].mxu1  ;;  %v582_v63 = vmul.f32 %v1445_v56, %v1445_v56  ;;  %v1471_v5 = vpop.f32.mrb[9].mxu0  ;;  %v485_v26 = vmul.f32 %v1467_v3, %v1467_v3 }
 0x109   :  { %607 = vadd.xlane.f32.xlu0 %v581_v54  ;;  %v580_v60 = vmul.f32 %v1449_v58, %v1449_v58  ;;  %v1475_v7 = vpop.f32.mrb[10].mxu0  ;;  %v483_v24 = vmul.f32 %v1471_v5, %v1471_v5 }
 0x10a   :  { %v1481_v10 = vpop.f32.mrb[11].mxu0  ;;  %v486_v27 = vmul.f32 %v1475_v7, %v1475_v7 }
 0x10b   :  { %605 = vadd.xlane.f32.xlu1 %v580_v60  ;;  %v484_v25 = vmul.f32 %v1481_v10, %v1481_v10 }
 0x10d   :  { %603 = vadd.xlane.f32.xlu0 %v579_v61  ;;  %v1461_v0 = vpop.f32.mrb[12].mxu1 }
 0x10e   :  { %v1463_v1 = vpop.f32.mrb[13].mxu1  ;;  %v585_v2 = vmul.f32 %v1461_v0, %v1461_v0 }
 0x10f   :  { %609 = vadd.xlane.f32.xlu1 %v582_v63  ;;  %v1469_v4 = vpop.f32.mrb[14].mxu1  ;;  %v583_v9 = vmul.f32 %v1463_v1, %v1463_v1  ;;  %v1487_v13 = vpop.f32.mrb[12].mxu0 }
 0x110   :  { %v1473_v6 = vpop.f32.mrb[15].mxu1  ;;  %v586_v11 = vmul.f32 %v1469_v4, %v1469_v4  ;;  %v1491_v15 = vpop.f32.mrb[13].mxu0  ;;  %v489_v30 = vmul.f32 %v1487_v13, %v1487_v13 }
 0x111   :  { %v584_v8 = vmul.f32 %v1473_v6, %v1473_v6  ;;  %615 = vadd.xlane.f32.xlu0 %v585_v2  ;;  %v1493_v16 = vpop.f32.mrb[14].mxu0  ;;  %v487_v28 = vmul.f32 %v1491_v15, %v1491_v15 }
 0x112   :  { %v1497_v18 = vpop.f32.mrb[15].mxu0  ;;  %v490_v31 = vmul.f32 %v1493_v16, %v1493_v16 }
 0x113   :  { %613 = vadd.xlane.f32.xlu1 %v584_v8  ;;  %v488_v29 = vmul.f32 %v1497_v18, %v1497_v18 }
 0x115   :  { %611 = vadd.xlane.f32.xlu0 %v583_v9 }
 0x117   :  { %617 = vadd.xlane.f32.xlu1 %v586_v11 }
 0x119   :  { %491 = vadd.xlane.f32.xlu0 %v475_v12 }
 0x11b   :  { %493 = vadd.xlane.f32.xlu1 %v476_v14 }
 0x11d   :  { %495 = vadd.xlane.f32.xlu0 %v477_v17 }
 0x11f   :  { %497 = vadd.xlane.f32.xlu1 %v478_v19 }
 0x121   :  { %499 = vadd.xlane.f32.xlu0 %v479_v20 }
 0x123   :  { %501 = vadd.xlane.f32.xlu1 %v480_v21 }
 0x125   :  { %503 = vadd.xlane.f32.xlu0 %v481_v22 }
 0x127   :  { %505 = vadd.xlane.f32.xlu1 %v482_v23 }
 0x129   :  { %507 = vadd.xlane.f32.xlu0 %v483_v24 }
 0x12b   :  { %509 = vadd.xlane.f32.xlu1 %v484_v25 }
 0x12d   :  { %511 = vadd.xlane.f32.xlu0 %v485_v26 }
 0x12f   :  { %513 = vadd.xlane.f32.xlu1 %v486_v27 }
 0x131   :  { %515 = vadd.xlane.f32.xlu0 %v487_v28 }
 0x133   :  { %517 = vadd.xlane.f32.xlu1 %v488_v29 }
 0x135   :  { %519 = vadd.xlane.f32.xlu0 %v489_v30 }
 0x137   :  { %521 = vadd.xlane.f32.xlu1 %v490_v31 }
 0x185   :  { %v592_v34 = vpop.xlane.xlu1 %591 }
 0x186   :  { %v588_v36 = vpop.xlane.xlu0 %587  ;;  %v621_v42 = vmax.f32 %v592_v34, 1e-12 }
 0x187   :  { %v619_v38 = vmax.f32 %v588_v36, 1e-12 }
 0x189   :  { %1202 = vrsqrt.f32 %v619_v38  ;;  %v594_v49 = vpop.xlane.xlu1 %593 }
 0x18a   :  { %v590_v39 = vpop.xlane.xlu0 %589  ;;  %v622_v54 = vmax.f32 %v594_v49, 1e-12 }
 0x18b   :  { %v620_v48 = vmax.f32 %v590_v39, 1e-12 }
 0x18d   :  { %1204 = vrsqrt.f32 %v620_v48 }
 0x18e   :  { %v600_v52 = vpop.xlane.xlu0 %599  ;;  %1206 = vrsqrt.f32 %v621_v42 }
 0x18f   :  { %1208 = vrsqrt.f32 %v622_v54  ;;  %v625_v22 = vmax.f32 %v600_v52, 1e-12 }
 0x190   :  { %v598_v60 = vpop.xlane.xlu1 %597 }
 0x191   :  { %v624_v14 = vmax.f32 %v598_v60, 1e-12 }
 0x192   :  { %v596_v61 = vpop.xlane.xlu0 %595 }
 0x193   :  { %v1203_v63 = vpop.eup %1202  ;;  %v623_v2 = vmax.f32 %v596_v61, 1e-12 }
 0x194   :  { %v602_v8 = vpop.xlane.xlu1 %601  ;;  %v651_v9 = vmul.f32 %v1203_v63, %v1399_v33 }
 0x195   :  { %1210 = vrsqrt.f32 %v623_v2  ;;  %v626_v33 = vmax.f32 %v602_v8, 1e-12 }
 0x196   :  { %v608_v11 = vpop.xlane.xlu0 %607  ;;  %764 = vxpose.xlu0.b32.start [1/16] %v651_v9, 128  ;;  %1212 = vrsqrt.f32 %v624_v14 }
 0x197   :  { %v1205_v12 = vpop.eup %1204  ;;  %1214 = vrsqrt.f32 %v625_v22  ;;  %v629_v52 = vmax.f32 %v608_v11, 1e-12 }
 0x198   :  { %v606_v17 = vpop.xlane.xlu1 %605  ;;  %v652_v19 = vmul.f32 %v1205_v12, %v1407_v37  ;;  %v1207_v20 = vpop.eup %1206  ;;  %1216 = vrsqrt.f32 %v626_v33 }
 0x199   :  { %v653_v24 = vmul.f32 %v1207_v20, %v1397_v32  ;;  %v1209_v25 = vpop.eup %1208  ;;  %v628_v36 = vmax.f32 %v606_v17, 1e-12 }
 0x19a   :  { %v604_v21 = vpop.xlane.xlu0 %603  ;;  %765 = vxpose.xlu0.b32.cont [2/16] %v652_v19, 128  ;;  %v654_v28 = vmul.f32 %v1209_v25, %v1403_v35 }
 0x19b   :  { %v627_v30 = vmax.f32 %v604_v21, 1e-12 }
 0x19c   :  { %v610_v23 = vpop.xlane.xlu1 %609 }
 0x19d   :  { %1218 = vrsqrt.f32 %v627_v30  ;;  %v630_v8 = vmax.f32 %v610_v23, 1e-12 }
 0x19e   :  { %v1528_v26 = vpop.xlane.xlu0 %615  ;;  %766 = vxpose.xlu0.b32.cont [3/16] %v653_v24, 128 }
 0x19f   :  { %v1211_v29 = vpop.eup %1210 }
 0x1a0   :  { %v1530_v27 = vpop.xlane.xlu1 %613  ;;  %v655_v34 = vmul.f32 %v1211_v29, %v1415_v41  ;;  %v1213_v32 = vpop.eup %1212 }
 0x1a1   :  { %v656_v48 = vmul.f32 %v1213_v32, %v1425_v46  ;;  %v1215_v49 = vpop.eup %1214  ;;  %v632_v29 = vmax.f32 %v1530_v27, 1e-12 }
 0x1a2   :  { %v612_v37 = vpop.xlane.xlu0 %611  ;;  %767 = vxpose.xlu0.b32.cont [4/16] %v654_v28, 128  ;;  %v657_v41 = vmul.f32 %v1215_v49, %v1413_v40  ;;  %v1217_v63 = vpop.eup %1216 }
 0x1a3   :  { %v658_v11 = vmul.f32 %v1217_v63, %v1421_v44  ;;  %v631_v19 = vmax.f32 %v612_v37, 1e-12  ;;  %v1544_v44 = vstv %s1639_s0 }
 0x1a4   :  { %v1533_v31 = vpop.xlane.xlu1 %617 }
 0x1a6   :  { %v492_v38 = vpop.xlane.xlu0 %491  ;;  %768 = vxpose.xlu0.b32.cont [5/16] %v655_v34, 128 }
 0x1a7   :  { %v523_v39 = vmax.f32 %v492_v38, 1e-12  ;;  %v1219_v14 = vpop.eup %1218 }
 0x1a8   :  { %v494_v42 = vpop.xlane.xlu1 %493  ;;  %v659_v25 = vmul.f32 %v1219_v14, %v1439_v53 }
 0x1a9   :  { %1220 = vrsqrt.f32 %v523_v39  ;;  %v524_v35 = vmax.f32 %v494_v42, 1e-12 }
 0x1aa   :  { %1222 = vrsqrt.f32 %v628_v36  ;;  %v496_v54 = vpop.xlane.xlu0 %495  ;;  %769 = vxpose.xlu0.b32.cont [6/16] %v656_v48, 128 }
 0x1ab   :  { %1224 = vrsqrt.f32 %v524_v35  ;;  %v525_v60 = vmax.f32 %v496_v54, 1e-12 }
 0x1ac   :  { %v498_v61 = vpop.xlane.xlu1 %497 }
 0x1ad   :  { %1226 = vrsqrt.f32 %v525_v60  ;;  %v526_v2 = vmax.f32 %v498_v61, 1e-12 }
 0x1ae   :  { %1228 = vrsqrt.f32 %v629_v52  ;;  %v500_v9 = vpop.xlane.xlu0 %499  ;;  %770 = vxpose.xlu0.b32.cont [7/16] %v657_v41, 128 }
 0x1af   :  { %1230 = vrsqrt.f32 %v526_v2  ;;  %v527_v46 = vmax.f32 %v500_v9, 1e-12 }
 0x1b0   :  { %v502_v12 = vpop.xlane.xlu1 %501 }
 0x1b1   :  { %1232 = vrsqrt.f32 %v527_v46  ;;  %v528_v17 = vmax.f32 %v502_v12, 1e-12 }
 0x1b2   :  { %1234 = vrsqrt.f32 %v630_v8  ;;  %v504_v20 = vpop.xlane.xlu0 %503  ;;  %771 = vxpose.xlu0.b32.cont [8/16] %v658_v11, 128  ;;  %v634_v8 = vmax.f32 %v1533_v31, 1e-12 }
 0x1b3   :  { %v1221_v40 = vpop.eup %1220  ;;  %1236 = vrsqrt.f32 %v528_v17  ;;  %v529_v21 = vmax.f32 %v504_v20, 1e-12 }
 0x1b4   :  { %v1223_v22 = vpop.eup %1222  ;;  %v555_v23 = vmul.f32 %v1221_v40, %v1423_v45  ;;  %v506_v24 = vpop.xlane.xlu1 %505 }
 0x1b5   :  { %v1225_v33 = vpop.eup %1224  ;;  %1238 = vrsqrt.f32 %v529_v21  ;;  %v530_v28 = vmax.f32 %v506_v24, 1e-12  ;;  %v660_v42 = vmul.f32 %v1223_v22, %v1449_v58 }
 0x1b6   :  { %1240 = vrsqrt.f32 %v631_v19  ;;  %v556_v37 = vmul.f32 %v1225_v33, %v1433_v50  ;;  %v508_v30 = vpop.xlane.xlu0 %507  ;;  %772 = vxpose.xlu0.b32.cont [9/16] %v659_v25, 128  ;;  %v668_v53 = vmul.f32 %v1544_v44, %v555_v23  ;;  %v633_v50 = vmax.f32 %v1528_v26, 1e-12 }
 0x1b7   :  { %v1227_v34 = vpop.eup %1226  ;;  %1242 = vrsqrt.f32 %v530_v28  ;;  %v531_v45 = vmax.f32 %v508_v30, 1e-12 }
 0x1b8   :  { %v1229_v32 = vpop.eup %1228  ;;  %v669_v36 = vmul.f32 %v1544_v44, %v556_v37  ;;  %v557_v38 = vmul.f32 %v1227_v34, %v1419_v43  ;;  %v510_v39 = vpop.xlane.xlu1 %509 }
 0x1b9   :  { %v1231_v48 = vpop.eup %1230  ;;  %1244 = vrsqrt.f32 %v531_v45  ;;  %v532_v27 = vmax.f32 %v510_v39, 1e-12  ;;  %v661_v63 = vmul.f32 %v1229_v32, %v1435_v51 }
 0x1ba   :  { %1246 = vrsqrt.f32 %v632_v29  ;;  %v983_v49 = vpack.c.bf16 %v669_v36, %v668_v53  ;;  %v558_v35 = vmul.f32 %v1231_v48, %v1427_v47  ;;  %v512_v52 = vpop.xlane.xlu0 %511  ;;  %773 = vxpose.xlu0.b32.cont [10/16] %v660_v42, 128  ;;  %v670_v43 = vmul.f32 %v1544_v44, %v557_v38 }
 0x1bb   :  { %v1233_v54 = vpop.eup %1232  ;;  %1248 = vrsqrt.f32 %v532_v27  ;;  %v533_v60 = vmax.f32 %v512_v52, 1e-12 }
 0x1bc   :  { %v1235_v61 = vpop.eup %1234  ;;  %984 = vst [vmem:[%s1640_s5] sm:$0xff] %v983_v49   ;;  %v671_v58 = vmul.f32 %v1544_v44, %v558_v35  ;;  %v559_v26 = vmul.f32 %v1233_v54, %v1447_v57  ;;  %v514_v41 = vpop.xlane.xlu1 %513 }
 0x1bd   :  { %v1237_v47 = vpop.eup %1236  ;;  %1250 = vrsqrt.f32 %v533_v60  ;;  %v534_v2 = vmax.f32 %v514_v41, 1e-12  ;;  %v662_v20 = vmul.f32 %v1235_v61, %v1445_v56 }
 0x1be   :  { %1252 = vrsqrt.f32 %v633_v50  ;;  %v988_v9 = vpack.c.bf16 %v671_v58, %v670_v43  ;;  %v560_v46 = vmul.f32 %v1237_v47, %v1457_v62  ;;  %774 = vxpose.xlu0.b32.cont [11/16] %v661_v63, 128  ;;  %v516_v12 = vpop.xlane.xlu0 %515  ;;  %v672_v51 = vmul.f32 %v1544_v44, %v559_v26 }
 0x1bf   :  { %v1239_v11 = vpop.eup %1238  ;;  %1254 = vrsqrt.f32 %v534_v2  ;;  %v535_v14 = vmax.f32 %v516_v12, 1e-12 }
 0x1c0   :  { %v1241_v17 = vpop.eup %1240  ;;  %1060 = vst [vmem:[%s1640_s5 + $0x8] sm:$0xff] %v988_v9   ;;  %v673_v57 = vmul.f32 %v1544_v44, %v560_v46  ;;  %v561_v19 = vmul.f32 %v1239_v11, %v1443_v55  ;;  %v518_v31 = vpop.xlane.xlu1 %517 }
 0x1c1   :  { %v1243_v62 = vpop.eup %1242  ;;  %1256 = vrsqrt.f32 %v535_v14  ;;  %v536_v40 = vmax.f32 %v518_v31, 1e-12  ;;  %v663_v37 = vmul.f32 %v1241_v17, %v1463_v1 }
 0x1c2   :  { %1258 = vrsqrt.f32 %v634_v8  ;;  %v993_v21 = vpack.c.bf16 %v673_v57, %v672_v51  ;;  %v562_v22 = vmul.f32 %v1243_v62, %v1451_v59  ;;  %775 = vxpose.xlu0.b32.cont [12/16] %v662_v20, 128  ;;  %v520_v23 = vpop.xlane.xlu0 %519  ;;  %v674_v55 = vmul.f32 %v1544_v44, %v561_v19 }
 0x1c3   :  { %v1245_v24 = vpop.eup %1244  ;;  %1260 = vrsqrt.f32 %v536_v40  ;;  %v537_v25 = vmax.f32 %v520_v23, 1e-12 }
 0x1c4   :  { %v1247_v33 = vpop.eup %1246  ;;  %1061 = vst [vmem:[%s1640_s5 + $0x10] sm:$0xff] %v993_v21   ;;  %v675_v56 = vmul.f32 %v1544_v44, %v562_v22  ;;  %v563_v28 = vmul.f32 %v1245_v24, %v1471_v5  ;;  %v522_v29 = vpop.xlane.xlu1 %521 }
 0x1c5   :  { %v1249_v59 = vpop.eup %1248  ;;  %1262 = vrsqrt.f32 %v537_v25  ;;  %v538_v30 = vmax.f32 %v522_v29, 1e-12  ;;  %v664_v38 = vmul.f32 %v1247_v33, %v1473_v6 }
 0x1c6   :  { %v998_v34 = vpack.c.bf16 %v675_v56, %v674_v55  ;;  %v564_v45 = vmul.f32 %v1249_v59, %v1481_v10  ;;  %776 = vxpose.xlu0.b32.cont [13/16] %v663_v37, 128  ;;  %v676_v36 = vmul.f32 %v1544_v44, %v563_v28 }
 0x1c7   :  { %v1251_v32 = vpop.eup %1250  ;;  %1264 = vrsqrt.f32 %v538_v30 }
 0x1c8   :  { %v1253_v53 = vpop.eup %1252  ;;  %1062 = vst [vmem:[%s1640_s5 + $0x18] sm:$0xff] %v998_v34   ;;  %v677_v5 = vmul.f32 %v1544_v44, %v564_v45  ;;  %v565_v1 = vmul.f32 %v1251_v32, %v1467_v3 }
 0x1c9   :  { %v1255_v39 = vpop.eup %1254  ;;  %v665_v3 = vmul.f32 %v1253_v53, %v1461_v0 }
 0x1ca   :  { %v1003_v42 = vpack.c.bf16 %v677_v5, %v676_v36  ;;  %v566_v10 = vmul.f32 %v1255_v39, %v1475_v7  ;;  %777 = vxpose.xlu0.b32.cont [14/16] %v664_v38, 128  ;;  %v678_v50 = vmul.f32 %v1544_v44, %v565_v1 }
 0x1cb   :  { %v1257_v48 = vpop.eup %1256 }
 0x1cc   :  { %v1259_v27 = vpop.eup %1258  ;;  %1063 = vst [vmem:[%s1640_s5 + $0x20] sm:$0xff] %v1003_v42   ;;  %v679_v49 = vmul.f32 %v1544_v44, %v566_v10  ;;  %v567_v35 = vmul.f32 %v1257_v48, %v1491_v15 }
 0x1cd   :  { %v1261_v6 = vpop.eup %1260  ;;  %v666_v15 = vmul.f32 %v1259_v27, %v1469_v4 }
 0x1ce   :  { %v1008_v52 = vpack.c.bf16 %v679_v49, %v678_v50  ;;  %v568_v54 = vmul.f32 %v1261_v6, %v1497_v18  ;;  %778 = vxpose.xlu0.b32.cont [15/16] %v665_v3, 128  ;;  %v680_v60 = vmul.f32 %v1544_v44, %v567_v35 }
 0x1cf   :  { %v1263_v7 = vpop.eup %1262 }
 0x1d0   :  { %1064 = vst [vmem:[%s1640_s5 + $0x28] sm:$0xff] %v1008_v52   ;;  %v681_v61 = vmul.f32 %v1544_v44, %v568_v54  ;;  %v569_v43 = vmul.f32 %v1263_v7, %v1487_v13 }
 0x1d1   :  { %v1265_v58 = vpop.eup %1264 }
 0x1d2   :  { %v1013_v0 = vpack.c.bf16 %v681_v61, %v680_v60  ;;  %v570_v26 = vmul.f32 %v1265_v58, %v1493_v16  ;;  %779 = vxpose.xlu0.b32.end [16/16] %v666_v15, 128  ;;  %v682_v18 = vmul.f32 %v1544_v44, %v569_v43 }
 0x1d4   :  { %1065 = vst [vmem:[%s1640_s5 + $0x30] sm:$0xff] %v1013_v0   ;;  %v683_v41 = vmul.f32 %v1544_v44, %v570_v26 }
 0x1d6   :  { %v1018_v63 = vpack.c.bf16 %v683_v41, %v682_v18 }
 0x1d8   :  { %1066 = vst [vmem:[%s1640_s5 + $0x38] sm:$0xff] %v1018_v63  }
 0x216   :  { %v780_v13 = vpop.trf.xlu0 }
 0x21a   :  { %v781_v4 = vpop.trf.xlu0 }
 0x21b   :  { %v1023_v47 = vpack.c.bf16 %v781_v4, %v780_v13 }
 0x21d   :  { %1024 = vst [vmem:[%s1641_s6] sm:$0xff] %v1023_v47  }
 0x21e   :  { %v782_v16 = vpop.trf.xlu0 }
 0x222   :  { %v783_v2 = vpop.trf.xlu0 }
 0x223   :  { %v1028_v8 = vpack.c.bf16 %v783_v2, %v782_v16 }
 0x225   :  { %1067 = vst [vmem:[%s1641_s6 + $0x8] sm:$0xff] %v1028_v8  }
 0x226   :  { %v784_v44 = vpop.trf.xlu0 }
 0x22a   :  { %v785_v9 = vpop.trf.xlu0 }
 0x22b   :  { %v1033_v46 = vpack.c.bf16 %v785_v9, %v784_v44 }
 0x22d   :  { %1068 = vst [vmem:[%s1641_s6 + $0x10] sm:$0xff] %v1033_v46  }
 0x22e   :  { %v786_v12 = vpop.trf.xlu0 }
 0x232   :  { %v787_v11 = vpop.trf.xlu0 }
 0x233   :  { %v1038_v14 = vpack.c.bf16 %v787_v11, %v786_v12 }
 0x235   :  { %1069 = vst [vmem:[%s1641_s6 + $0x18] sm:$0xff] %v1038_v14  }
 0x236   :  { %v788_v17 = vpop.trf.xlu0 }
 0x23a   :  { %v789_v51 = vpop.trf.xlu0 }
 0x23b   :  { %v1043_v57 = vpack.c.bf16 %v789_v51, %v788_v17 }
 0x23d   :  { %1070 = vst [vmem:[%s1641_s6 + $0x20] sm:$0xff] %v1043_v57  }
 0x23e   :  { %v790_v19 = vpop.trf.xlu0 }
 0x242   :  { %v791_v31 = vpop.trf.xlu0 }
 0x243   :  { %v1048_v20 = vpack.c.bf16 %v791_v31, %v790_v19 }
 0x245   :  { %1071 = vst [vmem:[%s1641_s6 + $0x28] sm:$0xff] %v1048_v20  }
 0x246   :  { %v792_v62 = vpop.trf.xlu0 }
 0x24a   :  { %v793_v40 = vpop.trf.xlu0 }
 0x24b   :  { %v1053_v21 = vpack.c.bf16 %v793_v40, %v792_v62 }
 0x24d   :  { %1072 = vst [vmem:[%s1641_s6 + $0x30] sm:$0xff] %v1053_v21  }
 0x24e   :  { %v794_v22 = vpop.trf.xlu0 }
 0x252   :  { %v795_v23 = vpop.trf.xlu0 }
 0x253   :  { %v1058_v24 = vpack.c.bf16 %v795_v23, %v794_v22 }
 0x255   :  { %1073 = vst [vmem:[%s1641_s6 + $0x38] sm:$0xff] %v1058_v24  }

// kernel: muscall_forward.3
= control target key start
LH: loop header
LB: loop body
LE: loop exit
PB: predicated region body
PF: predicated region fallthrough
CT: control target
= control target key end

     0   :  { %s2173_s0 = inlined_call_operand.vmem [shape: bf16[128,128], index: 0, kind: input, shape index: {}]   ;;  %s2174_s1 = inlined_call_operand.vmem [shape: bf16[128,128], index: 1, kind: input, shape index: {}]   ;;  %s2175_s2 = inlined_call_operand.vmem [shape: f32[128,128], index: 2, kind: output, shape index: {0}]   ;;  %s2176_s3 = inlined_call_operand.hbm [shape: f32[1,1], index: 3, kind: output, shape index: {1}]  }
   0x1   :  { %v1260_v0 = vld [vmem:[%s2174_s1] sm:$0xff]   ;;  %v1261_v1 = vld [vmem:[%s2174_s1 + $0x8] sm:$0xff]   ;;  %v1262_v2 = vld [vmem:[%s2174_s1 + $0x10] sm:$0xff]  }
   0x2   :  { %1200 = vmatprep.subr.bf16.mxu0 %v1260_v0  ;;  %1232 = vmatprep.subr.bf16.mxu1 %v1260_v0  ;;  %v1263_v3 = vld [vmem:[%s2174_s1 + $0x18] sm:$0xff]   ;;  %v1268_v4 = vld [vmem:[%s2173_s0] sm:$0xff]   ;;  %v1265_v7 = vld [vmem:[%s2174_s1 + $0x28] sm:$0xff]  }
   0x3   :  { %1201 = vmatpush3.bf16.msra.mxu0 %v1260_v0  ;;  %1240 = vmatpush3.bf16.msra.mxu1 %v1260_v0  ;;  %v1264_v5 = vld [vmem:[%s2174_s1 + $0x20] sm:$0xff]  }
   0x4   :  { %1202 = vmatprep.subr.bf16.mxu0 %v1261_v1  ;;  %1233 = vmatprep.subr.bf16.mxu1 %v1261_v1  ;;  %v1272_v6 = vld [vmem:[%s2173_s0 + $0x20] sm:$0xff]  }
   0x5   :  { %1216 = vmatprep.mubr.bf16.mxu0 %v1268_v4  ;;  %1224 = vmatprep.mubr.bf16.mxu1 %v1272_v6 }
   0x7   :  { %1203 = vmatpush3.bf16.msra.mxu0 %v1261_v1  ;;  %1241 = vmatpush3.bf16.msra.mxu1 %v1261_v1 }
   0x8   :  { %1204 = vmatprep.subr.bf16.mxu0 %v1262_v2  ;;  %1234 = vmatprep.subr.bf16.mxu1 %v1262_v2 }
   0xb   :  { %1205 = vmatpush3.bf16.msra.mxu0 %v1262_v2  ;;  %1242 = vmatpush3.bf16.msra.mxu1 %v1262_v2 }
   0xc   :  { %1206 = vmatprep.subr.bf16.mxu0 %v1263_v3  ;;  %1235 = vmatprep.subr.bf16.mxu1 %v1263_v3 }
   0xf   :  { %1207 = vmatpush3.bf16.msra.mxu0 %v1263_v3  ;;  %1243 = vmatpush3.bf16.msra.mxu1 %v1263_v3 }
  0x10   :  { %1208 = vmatprep.subr.bf16.mxu0 %v1264_v5  ;;  %1236 = vmatprep.subr.bf16.mxu1 %v1264_v5 }
  0x11   :  { %9 = vsyncpa [#allocation10], 0  ;;  %v1266_v8 = vld [vmem:[%s2174_s1 + $0x30] sm:$0xff]   ;;  %v1267_v9 = vld [vmem:[%s2174_s1 + $0x38] sm:$0xff]   ;;  %v257_v16 = vlaneseq  ;;  %v1374_v22 = vmov -1e+30  }
  0x12   :  { %v1269_v10 = vld [vmem:[%s2173_s0 + $0x8] sm:$0xff]   ;;  %v1270_v12 = vld [vmem:[%s2173_s0 + $0x10] sm:$0xff]   ;;  %v1271_v14 = vld [vmem:[%s2173_s0 + $0x18] sm:$0xff]   ;;  %781 = vst [vmem:[#allocation4] sm:$0x1] %v1374_v22  ;;  %v2178_v23 = vmov 0.0  }
  0x13   :  { %1209 = vmatpush3.bf16.msra.mxu0 %v1264_v5  ;;  %1244 = vmatpush3.bf16.msra.mxu1 %v1264_v5  ;;  %v1273_v11 = vld [vmem:[%s2173_s0 + $0x28] sm:$0xff]   ;;  %v1274_v13 = vld [vmem:[%s2173_s0 + $0x30] sm:$0xff]   ;;  %v1275_v15 = vld [vmem:[%s2173_s0 + $0x38] sm:$0xff]   ;;  %v1446_v17 = vshrl.u32 %v257_v16, 7  ;;  %v1451_v19 = vand.u32 127, %v257_v16  ;;  %vm2177_vm7 = vcmask 7168  }
  0x14   :  { %1210 = vmatprep.subr.bf16.mxu0 %v1265_v7  ;;  %1237 = vmatprep.subr.bf16.mxu1 %v1265_v7  ;;  %782 = vst [vmem:[#allocation5] sm:$0x1] %v2178_v23  ;;  %345 = vst.msk [vmem:[#allocation2] sm:$0xff] %vm2177_vm7, %v1374_v22  ;;  %v1376_v54 = vmov 0   ;;  %s1377_s20 = smov [#allocation9]  }
  0x15   :  { %v1449_v18 = vadd.s32 16, %v1446_v17  ;;  %v1456_v20 = vadd.s32 24, %v1446_v17  ;;  %v1459_v21 = vadd.s32 8, %v1446_v17  ;;  %vm893_vm1 = vcmp.eq.s32.totalorder %v1446_v17, %v1451_v19  ;;  %346 = vst.msk [vmem:[#allocation2 + $0x8] sm:$0xff] %vm2177_vm7, %v1374_v22  ;;  %347 = vst.msk [vmem:[#allocation2 + $0x10] sm:$0xff] %vm2177_vm7, %v1374_v22  ;;  %1258 = vset.pattern.permute.xlu0 %v1376_v54  ;;  %1259 = vset.pattern.permute.xlu1 %v1376_v54  ;;  %s1158_s21 = sshll.u32 %s1377_s20, 4  ;;  %s1159_s21 = int_to_ptr.vmem [resolvable:$true] %s1158_s21 }
  0x16   :  { %v1469_v24 = vadd.s32 32, %v1446_v17  ;;  %v1474_v25 = vadd.s32 40, %v1446_v17  ;;  %v1477_v26 = vadd.s32 48, %v1446_v17  ;;  %v1484_v27 = vadd.s32 56, %v1446_v17  ;;  %348 = vst.msk [vmem:[#allocation2 + $0x18] sm:$0xff] %vm2177_vm7, %v1374_v22  ;;  %349 = vst.msk [vmem:[#allocation2 + $0x20] sm:$0xff] %vm2177_vm7, %v1374_v22  ;;  %p1355_p1 = scmp.lt.s32.totalorder %s1159_s21, %s1159_s21 }
  0x17   :  { %1211 = vmatpush3.bf16.msra.mxu0 %v1265_v7  ;;  %1245 = vmatpush3.bf16.msra.mxu1 %v1265_v7  ;;  %vm895_vm0 = vcmp.eq.s32.totalorder %v1449_v18, %v1451_v19  ;;  %vm896_vm2 = vcmp.eq.s32.totalorder %v1456_v20, %v1451_v19  ;;  %vm894_vm3 = vcmp.eq.s32.totalorder %v1459_v21, %v1451_v19  ;;  %v266_v28 = vadd.s32 64, %v1446_v17  ;;  %s1350_s22 = scalar_lea.vmem %s1159_s21, 16  ;;  %s1354_s23 = scalar_lea.vmem %s1159_s21, 32 }
  0x18   :  { %1212 = vmatprep.subr.bf16.mxu0 %v1266_v8  ;;  %1238 = vmatprep.subr.bf16.mxu1 %v1266_v8  ;;  %vm897_vm4 = vcmp.eq.s32.totalorder %v1469_v24, %v1451_v19  ;;  %vm898_vm5 = vcmp.eq.s32.totalorder %v1474_v25, %v1451_v19  ;;  %vm899_vm6 = vcmp.eq.s32.totalorder %v1477_v26, %v1451_v19  ;;  %v1491_v29 = vadd.s32 72, %v1446_v17  ;;  %p1351_p0 = scmp.ne.s32.totalorder %s1159_s21, %s1350_s22  ;;  %p1356_p2 = scmp.lt.s32.totalorder %s1354_s23, %s1350_s22 }
  0x19   :  { %vm901_vm8 = vcmp.eq.s32.totalorder %v266_v28, %v1451_v19  ;;  %v268_v30 = vadd.s32 80, %v1446_v17  ;;  %v269_v31 = vadd.s32 88, %v1446_v17  ;;  %v1500_v32 = vadd.s32 96, %v1446_v17  ;;  %350 = vst.msk [vmem:[#allocation2 + $0x28] sm:$0xff] %vm2177_vm7, %v1374_v22  ;;  %351 = vst.msk [vmem:[#allocation2 + $0x30] sm:$0xff] %vm2177_vm7, %v1374_v22 }
  0x1a   :  { %vm902_vm9 = vcmp.eq.s32.totalorder %v1491_v29, %v1451_v19  ;;  %v1505_v33 = vadd.s32 104, %v1446_v17  ;;  %v1508_v34 = vadd.s32 112, %v1446_v17  ;;  %v1515_v35 = vadd.s32 120, %v1446_v17  ;;  %352 = vst.msk [vmem:[#allocation2 + $0x38] sm:$0xff] %vm2177_vm7, %v1374_v22  ;;  %353 = vst.msk [vmem:[#allocation2 + $0x40] sm:$0xff] %vm2177_vm7, %v1374_v22  ;;  %p1357_p3 = por %p1356_p2, %p1355_p1 }
  0x1b   :  { %1213 = vmatpush3.bf16.msra.mxu0 %v1266_v8  ;;  %1246 = vmatpush3.bf16.msra.mxu1 %v1266_v8  ;;  %vm903_vm10 = vcmp.eq.s32.totalorder %v268_v30, %v1451_v19  ;;  %vm904_vm11 = vcmp.eq.s32.totalorder %v269_v31, %v1451_v19  ;;  %354 = vst.msk [vmem:[#allocation2 + $0x48] sm:$0xff] %vm2177_vm7, %v1374_v22  ;;  %355 = vst.msk [vmem:[#allocation2 + $0x50] sm:$0xff] %vm2177_vm7, %v1374_v22  ;;  %vm312_vm13 = vcmp.lt.s32.totalorder %v1451_v19, 8 }
  0x1c   :  { %1214 = vmatprep.subr.bf16.mxu0 %v1267_v9  ;;  %1239 = vmatprep.subr.bf16.mxu1 %v1267_v9  ;;  %vm907_vm14 = vcmp.eq.s32.totalorder %v1508_v34, %v1451_v19  ;;  %356 = vst.msk [vmem:[#allocation2 + $0x58] sm:$0xff] %vm2177_vm7, %v1374_v22  ;;  %357 = vst.msk [vmem:[#allocation2 + $0x60] sm:$0xff] %vm2177_vm7, %v1374_v22  ;;  %p1358_p4 = pnand %p1357_p3, %p1351_p0 }
  0x1d   :  { %358 = vst.msk [vmem:[#allocation2 + $0x68] sm:$0xff] %vm2177_vm7, %v1374_v22  ;;  %359 = vst.msk [vmem:[#allocation2 + $0x70] sm:$0xff] %vm2177_vm7, %v1374_v22 }
  0x1e   :  { %360 = vst.msk [vmem:[#allocation2 + $0x78] sm:$0xff] %vm2177_vm7, %v1374_v22  ;;  %361 = vst.msk [vmem:[#allocation3] sm:$0xff] %vm2177_vm7, %v2178_v23 }
  0x1f   :  { %1215 = vmatpush3.bf16.msra.mxu0 %v1267_v9  ;;  %1247 = vmatpush3.bf16.msra.mxu1 %v1267_v9  ;;  %362 = vst.msk [vmem:[#allocation3 + $0x8] sm:$0xff] %vm2177_vm7, %v2178_v23  ;;  %363 = vst.msk [vmem:[#allocation3 + $0x10] sm:$0xff] %vm2177_vm7, %v2178_v23 }
  0x20   :  { %364 = vst.msk [vmem:[#allocation3 + $0x18] sm:$0xff] %vm2177_vm7, %v2178_v23  ;;  %365 = vst.msk [vmem:[#allocation3 + $0x20] sm:$0xff] %vm2177_vm7, %v2178_v23 }
  0x21   :  { %366 = vst.msk [vmem:[#allocation3 + $0x28] sm:$0xff] %vm2177_vm7, %v2178_v23  ;;  %367 = vst.msk [vmem:[#allocation3 + $0x30] sm:$0xff] %vm2177_vm7, %v2178_v23 }
  0x22   :  { %1217 = vmatmul.mubr.bf16.vlgmr.msra.gmra.mrb[0].mxu0 %v1269_v10  ;;  %1225 = vmatmul.mubr.bf16.vlgmr.msra.gmra.mrb[0].mxu1 %v1273_v11  ;;  %368 = vst.msk [vmem:[#allocation3 + $0x38] sm:$0xff] %vm2177_vm7, %v2178_v23  ;;  %369 = vst.msk [vmem:[#allocation3 + $0x40] sm:$0xff] %vm2177_vm7, %v2178_v23 }
  0x23   :  { %1220 = vmatprep.mubr.bf16.mxu0 %v1270_v12  ;;  %1228 = vmatprep.mubr.bf16.mxu1 %v1274_v13  ;;  %370 = vst.msk [vmem:[#allocation3 + $0x48] sm:$0xff] %vm2177_vm7, %v2178_v23  ;;  %371 = vst.msk [vmem:[#allocation3 + $0x50] sm:$0xff] %vm2177_vm7, %v2178_v23 }
  0x24   :  { %372 = vst.msk [vmem:[#allocation3 + $0x58] sm:$0xff] %vm2177_vm7, %v2178_v23  ;;  %373 = vst.msk [vmem:[#allocation3 + $0x60] sm:$0xff] %vm2177_vm7, %v2178_v23 }
  0x25   :  { %374 = vst.msk [vmem:[#allocation3 + $0x68] sm:$0xff] %vm2177_vm7, %v2178_v23  ;;  %375 = vst.msk [vmem:[#allocation3 + $0x70] sm:$0xff] %vm2177_vm7, %v2178_v23 }
  0x26   :  { %376 = vst.msk [vmem:[#allocation3 + $0x78] sm:$0xff] %vm2177_vm7, %v2178_v23  ;;  %vm1573_vm15 = vmand %vm895_vm0, %vm312_vm13 }
  0x27   :  { %vm1582_vm12 = vmand %vm893_vm1, %vm312_vm13 }
  0x28   :  { %vm1591_vm7 = vmand %vm896_vm2, %vm312_vm13 }
  0x29   :  { %vm1600_vm0 = vmand %vm894_vm3, %vm312_vm13 }
  0x2a   :  { %1221 = vmatmul.mubr.bf16.gmra.mrb[4].mxu0 %v1271_v14  ;;  %1229 = vmatmul.mubr.bf16.gmra.mrb[4].mxu1 %v1275_v15  ;;  %vm1608_vm1 = vmand %vm903_vm10, %vm312_vm13 }
  0x2b   :  { %vm1617_vm2 = vmand %vm897_vm4, %vm312_vm13 }
  0x2c   :  { %vm1627_vm3 = vmand %vm901_vm8, %vm312_vm13 }
  0x2d   :  { %vm1651_vm4 = vmand %vm904_vm11, %vm312_vm13  ;;  %vm2213_vm11 = vcmp.eq.s32.totalorder %v1500_v32, %v1451_v19 }
  0x2e   :  { %vm1673_vm8 = vmand %vm898_vm5, %vm312_vm13 }
  0x2f   :  { %vm1697_vm5 = vmand %vm902_vm9, %vm312_vm13 }
  0x30   :  { %vm1750_vm10 = vmand %vm907_vm14, %vm312_vm13  ;;  %vm2216_vm14 = vcmp.eq.s32.totalorder %v1515_v35, %v1451_v19 }
  0xf5   :  { %v1218_v42 = vpop.f32.mrb[0].mxu0  ;;  %v1621_v43 = vpop.f32.mrb[0].mxu1 }
  0xf6   :  { %242 = vst [vmem:[%s2175_s2 + $0x10] sm:$0xff] %v1218_v42  ;;  %v928_v45 = vsel %vm1573_vm15, %v1218_v42, 0.0  ;;  %v1636_v46 = vpop.f32.mrb[1].mxu0  ;;  %250 = vst [vmem:[%s2175_s2 + $0x50] sm:$0xff] %v1621_v43  ;;  %v936_v47 = vsel %vm1608_vm1, %v1621_v43, 0.0  ;;  %v1645_v48 = vpop.f32.mrb[1].mxu1 }
  0xf7   :  { %240 = vst [vmem:[%s2175_s2] sm:$0xff] %v1636_v46  ;;  %v784_v50 = vmax.f32 %v1636_v46, -1e+30  ;;  %v1219_v51 = vpop.f32.mrb[2].mxu0  ;;  %v1663_v52 = vsel %vm312_vm13, %v1636_v46, -1e+30  ;;  %v926_v53 = vsel %vm1582_vm12, %v1636_v46, 0.0  ;;  %vm1759_vm12 = vmand %vm2213_vm11, %vm312_vm13 }
  0xf8   :  { %248 = vst [vmem:[%s2175_s2 + $0x40] sm:$0xff] %v1645_v48  ;;  %243 = vst [vmem:[%s2175_s2 + $0x18] sm:$0xff] %v1219_v51  ;;  %v929_v55 = vsel %vm1591_vm7, %v1219_v51, 0.0  ;;  %393 = vmax.xlane.f32.xlu0 %v1663_v52  ;;  %v180_v56 = vpop.f32.mrb[3].mxu0  ;;  %v934_v57 = vsel %vm1627_vm3, %v1645_v48, 0.0  ;;  %v1690_v58 = vpop.f32.mrb[2].mxu1 }
  0xf9   :  { %v788_v60 = vmax.f32 %v784_v50, -1e+30  ;;  %241 = vst [vmem:[%s2175_s2 + $0x8] sm:$0xff] %v180_v56  ;;  %v927_v61 = vsel %vm1600_vm0, %v180_v56, 0.0  ;;  %v1708_v62 = vsel %vm312_vm13, %v180_v56, -1e+30  ;;  %vm1715_vm7 = vmand %vm899_vm6, %vm312_vm13  ;;  %vm2208_vm6 = vcmp.eq.s32.totalorder %v1484_v27, %v1451_v19 }
  0xfa   :  { %251 = vst [vmem:[%s2175_s2 + $0x58] sm:$0xff] %v1690_v58  ;;  %v937_v0 = vsel %vm1651_vm4, %v1690_v58, 0.0  ;;  %v942_v1 = vadd.f32 %v927_v61, %v926_v53  ;;  %395 = vmax.xlane.f32.xlu1 %v1708_v62  ;;  %vm1732_vm9 = vmand %vm2208_vm6, %vm312_vm13  ;;  %v1736_v3 = vpop.f32.mrb[3].mxu1  ;;  %v1765_v11 = vsel %vm312_vm13, %v1218_v42, -1e+30  ;;  %vm2219_vm0 = vcmp.eq.s32.totalorder %v1505_v33, %v1451_v19 }
  0xfb   :  { %v792_v4 = vmax.f32 %v788_v60, -1e+30  ;;  %249 = vst [vmem:[%s2175_s2 + $0x48] sm:$0xff] %v1736_v3  ;;  %v935_v5 = vsel %vm1697_vm5, %v1736_v3, 0.0  ;;  %vm1774_vm15 = vmand %vm2216_vm14, %vm312_vm13  ;;  %v1837_v35 = vsel %vm312_vm13, %v1219_v51, -1e+30 }
  0xfc   :  { %v943_v7 = vadd.f32 %v942_v1, %v928_v45  ;;  %vm1798_vm5 = vmand %vm2219_vm0, %vm312_vm13  ;;  %v783_v56 = vld [vmem:[#allocation4] sm:$0x1]  ;;  %v814_v61 = vsub.s32 0, %v1446_v17  ;;  %vm2222_vm1 = vcmask 7168  }
  0xfd   :  { %v796_v9 = vmax.f32 %v792_v4, -1e+30  ;;  %v1222_v10 = vpop.f32.mrb[4].mxu0  ;;  %v1767_v12 = vpop.f32.mrb[4].mxu1  ;;  %vm2224_vm3 = vmmov %vm2222_vm1 }
  0xfe   :  { %246 = vst [vmem:[%s2175_s2 + $0x30] sm:$0xff] %v1222_v10  ;;  %v932_v14 = vsel %vm1715_vm7, %v1222_v10, 0.0  ;;  %397 = vmax.xlane.f32.xlu1 %v1765_v11  ;;  %v193_v15 = vpop.f32.mrb[5].mxu0  ;;  %v944_v16 = vadd.f32 %v943_v7, %v929_v55  ;;  %254 = vst [vmem:[%s2175_s2 + $0x70] sm:$0xff] %v1767_v12  ;;  %v940_v18 = vsel %vm1750_vm10, %v1767_v12, 0.0  ;;  %v1791_v20 = vpop.f32.mrb[5].mxu1 }
  0xff   :  { %v798_v22 = vmax.f32 %v796_v9, -1e+30  ;;  %244 = vst [vmem:[%s2175_s2 + $0x20] sm:$0xff] %v193_v15  ;;  %v930_v24 = vsel %vm1617_vm2, %v193_v15, 0.0  ;;  %v1223_v25 = vpop.f32.mrb[6].mxu0  ;;  %252 = vst [vmem:[%s2175_s2 + $0x60] sm:$0xff] %v1791_v20 }
 0x100   :  { %v938_v26 = vsel %vm1759_vm12, %v1791_v20, 0.0  ;;  %v1814_v27 = vpop.f32.mrb[6].mxu1  ;;  %v945_v28 = vadd.f32 %v944_v16, %v930_v24  ;;  %247 = vst [vmem:[%s2175_s2 + $0x38] sm:$0xff] %v1223_v25  ;;  %v933_v29 = vsel %vm1732_vm9, %v1223_v25, 0.0  ;;  %v196_v30 = vpop.f32.mrb[7].mxu0  ;;  %vm2223_vm2 = vmmov %vm2222_vm1 }
 0x101   :  { %255 = vst [vmem:[%s2175_s2 + $0x78] sm:$0xff] %v1814_v27  ;;  %v1825_v31 = vpop.f32.mrb[7].mxu1  ;;  %v941_v32 = vsel %vm1774_vm15, %v1814_v27, 0.0  ;;  %v799_v33 = vrot.slane %v798_v22, 4  ;;  %245 = vst [vmem:[%s2175_s2 + $0x28] sm:$0xff] %v196_v30  ;;  %v931_v34 = vsel %vm1673_vm8, %v196_v30, 0.0 }
 0x102   :  { %253 = vst [vmem:[%s2175_s2 + $0x68] sm:$0xff] %v1825_v31  ;;  %v939_v36 = vsel %vm1798_vm5, %v1825_v31, 0.0  ;;  %v946_v37 = vadd.f32 %v945_v28, %v931_v34  ;;  %399 = vmax.xlane.f32.xlu1 %v1837_v35  ;;  %v1849_v39 = vsel %vm312_vm13, %v193_v15, -1e+30  ;;  %v1854_v51 = vsel %vm312_vm13, %v196_v30, -1e+30  ;;  %vm2225_vm4 = vmmov %vm2222_vm1 }
 0x103   :  { %v800_v38 = vmax.f32 %v798_v22, %v799_v33  ;;  %v1864_v63 = vsel %vm312_vm13, %v1222_v10, -1e+30  ;;  %v1877_v17 = vsel %vm312_vm13, %v1223_v25, -1e+30  ;;  %v1898_v9 = vsel %vm312_vm13, %v1621_v43, -1e+30  ;;  %vm2226_vm8 = vmmov %vm2222_vm1 }
 0x104   :  { %v947_v41 = vadd.f32 %v946_v37, %v932_v14  ;;  %v1904_v10 = vsel %vm312_vm13, %v1690_v58, -1e+30  ;;  %vm2227_vm7 = vmmov %vm2222_vm1 }
 0x105   :  { %v801_v42 = vrot.slane %v800_v38, 2  ;;  %vm2228_vm6 = vmmov %vm2222_vm1 }
 0x106   :  { %v948_v45 = vadd.f32 %v947_v41, %v933_v29  ;;  %401 = vmax.xlane.f32.xlu1 %v1849_v39  ;;  %vm2229_vm9 = vmmov %vm2222_vm1 }
 0x107   :  { %v802_v50 = vmax.f32 %v800_v38, %v801_v42  ;;  %v806_v42 = vld [vmem:[#allocation5] sm:$0x1]  ;;  %vm2230_vm10 = vmmov %vm2222_vm1 }
 0x108   :  { %v949_v53 = vadd.f32 %v948_v45, %v934_v57  ;;  %vm2231_vm11 = vmmov %vm2222_vm1 }
 0x109   :  { %v803_v55 = vrot.slane %v802_v50, 1  ;;  %vm2232_vm12 = vmmov %vm2222_vm1 }
 0x10a   :  { %v950_v59 = vadd.f32 %v949_v53, %v935_v5  ;;  %403 = vmax.xlane.f32.xlu1 %v1854_v51  ;;  %vm2233_vm14 = vmmov %vm2222_vm1 }
 0x10b   :  { %v804_v60 = vmax.f32 %v802_v50, %v803_v55  ;;  %v1907_v55 = vld [vmem:[#allocation2] sm:$0xff]  ;;  %vm2234_vm15 = vmmov %vm2222_vm1 }
 0x10c   :  { %v951_v44 = vadd.f32 %v950_v59, %v936_v47  ;;  %v1909_v59 = vld [vmem:[#allocation2 + $0x8] sm:$0xff]  ;;  %vm2236_vm0 = vmmov %vm2222_vm1 }
 0x10d   :  { %v805_v57 = vmax.f32 %v783_v56, %v804_v60  ;;  %vm2239_vm5 = vmmov %vm2236_vm0 }
 0x10e   :  { %v952_v1 = vadd.f32 %v951_v44, %v937_v0  ;;  %405 = vmax.xlane.f32.xlu1 %v1864_v63  ;;  %v1884_v0 = vsel %vm312_vm13, %v1645_v48, -1e+30 }
 0x10f   :  { %v815_v2 = vrot.slane %v805_v57, %v814_v61  ;;  %888 = vst [vmem:[#allocation4] sm:$0x1] %v805_v57 }
 0x110   :  { %v953_v4 = vadd.f32 %v952_v1, %v938_v26  ;;  %v807_v26 = vsub.f32 %v783_v56, %v805_v57  ;;  %v1922_v1 = vld [vmem:[#allocation2 + $0x10] sm:$0xff] }
 0x111   :  { %v817_v40 = vsub.f32 %v1636_v46, %v815_v2  ;;  %v818_v5 = vsub.f32 -1e+30, %v815_v2  ;;  %v1892_v46 = vsel %vm312_vm13, %v1736_v3, -1e+30 }
 0x112   :  { %v954_v6 = vadd.f32 %v953_v4, %v939_v36  ;;  %407 = vmax.xlane.f32.xlu1 %v1877_v17  ;;  %v808_v30 = vmul.f32 1.442695, %v807_v26  ;;  %v1973_v26 = vsel %vm312_vm13, %v1791_v20, -1e+30 }
 0x113   :  { %v833_v47 = vmul.f32 1.442695, %v817_v40  ;;  %v835_v49 = vmul.f32 1.442695, %v818_v5  ;;  %v1929_v40 = vld [vmem:[#allocation2 + $0x18] sm:$0xff] }
 0x114   :  { %v955_v7 = vadd.f32 %v954_v6, %v940_v18 }
 0x115   :  { %1276 = vpow2.f32 %v833_v47  ;;  %v1936_v47 = vld [vmem:[#allocation2 + $0x20] sm:$0xff] }
 0x116   :  { %1278 = vpow2.f32 %v835_v49  ;;  %409 = vmax.xlane.f32.xlu1 %v1884_v0  ;;  %v1887_v8 = vadd.f32 %v955_v7, %v941_v32 }
 0x117   :  { %1280 = vpow2.f32 %v808_v30 }
 0x11a   :  { %411 = vmax.xlane.f32.xlu1 %v1892_v46 }
 0x11e   :  { %413 = vmax.xlane.f32.xlu1 %v1898_v9 }
 0x11f   :  { %v1277_v48 = vpop.eup %1276 }
 0x120   :  { %v1279_v13 = vpop.eup %1278 }
 0x121   :  { %v865_v14 = vadd.f32 %v1279_v13, %v1277_v48  ;;  %v1281_v41 = vpop.eup %1280 }
 0x122   :  { %415 = vmax.xlane.f32.xlu1 %v1904_v10  ;;  %v810_v50 = vmul.f32 %v1281_v41, %v806_v42 }
 0x123   :  { %v866_v3 = vadd.f32 %v1279_v13, %v865_v14 }
 0x125   :  { %v867_v15 = vadd.f32 %v1279_v13, %v866_v3 }
 0x127   :  { %v868_v16 = vadd.f32 %v1279_v13, %v867_v15  ;;  %v1952_v15 = vld [vmem:[#allocation2 + $0x30] sm:$0xff] }
 0x129   :  { %v869_v18 = vadd.f32 %v1279_v13, %v868_v16 }
 0x12b   :  { %v870_v21 = vadd.f32 %v1279_v13, %v869_v18 }
 0x12d   :  { %v871_v22 = vadd.f32 %v1279_v13, %v870_v21  ;;  %v1959_v21 = vld [vmem:[#allocation2 + $0x38] sm:$0xff] }
 0x12f   :  { %v872_v43 = vadd.f32 %v1279_v13, %v871_v22 }
 0x131   :  { %v873_v24 = vadd.f32 %v1279_v13, %v872_v43 }
 0x133   :  { %v874_v25 = vadd.f32 %v1279_v13, %v873_v24  ;;  %v1966_v24 = vld [vmem:[#allocation2 + $0x40] sm:$0xff] }
 0x135   :  { %v875_v28 = vadd.f32 %v1279_v13, %v874_v25 }
 0x137   :  { %v876_v29 = vadd.f32 %v1279_v13, %v875_v28 }
 0x139   :  { %v877_v32 = vadd.f32 %v1279_v13, %v876_v29  ;;  %v1978_v29 = vld [vmem:[#allocation2 + $0x48] sm:$0xff] }
 0x13b   :  { %v878_v58 = vadd.f32 %v1279_v13, %v877_v32 }
 0x13d   :  { %v879_v33 = vadd.f32 %v1279_v13, %v878_v58  ;;  %v1945_v13 = vld [vmem:[#allocation2 + $0x28] sm:$0xff]  ;;  %v1986_v58 = vld [vmem:[#allocation2 + $0x50] sm:$0xff] }
 0x13f   :  { %v880_v34 = vrot.slane %v879_v33, 4 }
 0x141   :  { %v881_v36 = vadd.f32 %v880_v34, %v879_v33 }
 0x143   :  { %v882_v37 = vrot.slane %v881_v36, 2 }
 0x145   :  { %v883_v38 = vadd.f32 %v882_v37, %v881_v36  ;;  %v1995_v36 = vld [vmem:[#allocation2 + $0x58] sm:$0xff] }
 0x147   :  { %v884_v45 = vrot.slane %v883_v38, 1 }
 0x149   :  { %v885_v53 = vadd.f32 %v884_v45, %v883_v38 }
 0x14b   :  { %v886_v54 = vadd.f32 %v885_v53, %v810_v50 }
 0x14d   :  { %887 = vst [vmem:[#allocation5] sm:$0x1] %v886_v54  ;;  %v2013_v54 = vsel %vm312_vm13, %v1825_v31, -1e+30 }
 0x185   :  { %v394_v56 = vpop.xlane.xlu0 %393 }
 0x186   :  { %v1912_v60 = vmax.f32 %v1907_v55, %v394_v56  ;;  %v2019_v56 = vsel %vm312_vm13, %v1767_v12, -1e+30 }
 0x187   :  { %v396_v61 = vpop.xlane.xlu1 %395 }
 0x188   :  { %v457_v44 = vsub.f32 %v1907_v55, %v1912_v60  ;;  %714 = vst.msk [vmem:[#allocation2] sm:$0xff] %vm2222_vm1, %v1912_v60  ;;  %v1919_v57 = vmax.f32 %v1909_v59, %v396_v61  ;;  %523 = vperm.xlu0 %1258, %v1912_v60   ;;  %v2028_v61 = vld [vmem:[#allocation2 + $0x60] sm:$0xff]  ;;  %vm2242_vm1 = vmmov %vm2236_vm0 }
 0x18a   :  { %715 = vst.msk [vmem:[#allocation2 + $0x8] sm:$0xff] %vm2223_vm2, %v1919_v57  ;;  %vm2244_vm2 = vmmov %vm2236_vm0 }
 0x18b   :  { %v398_v2 = vpop.xlane.xlu1 %397 }
 0x18c   :  { %v1927_v4 = vmax.f32 %v1922_v1, %v398_v2 }
 0x18e   :  { %716 = vst.msk [vmem:[#allocation2 + $0x10] sm:$0xff] %vm2224_vm3, %v1927_v4  ;;  %vm2245_vm3 = vmmov %vm2236_vm0 }
 0x18f   :  { %v400_v5 = vpop.xlane.xlu1 %399 }
 0x190   :  { %v1934_v6 = vmax.f32 %v1929_v40, %v400_v5 }
 0x192   :  { %717 = vst.msk [vmem:[#allocation2 + $0x18] sm:$0xff] %vm2225_vm4, %v1934_v6  ;;  %vm1124_vm4 = vcmask 1040384  }
 0x193   :  { %v402_v7 = vpop.xlane.xlu1 %401 }
 0x194   :  { %v1943_v48 = vmax.f32 %v1936_v47, %v402_v7  ;;  %v441_v7 = vld [vmem:[#allocation3] sm:$0xff] }
 0x196   :  { %718 = vst.msk [vmem:[#allocation2 + $0x20] sm:$0xff] %vm2226_vm8, %v1943_v48  ;;  %vm2250_vm8 = vmmov %vm2236_vm0 }
 0x197   :  { %v404_v14 = vpop.xlane.xlu1 %403 }
 0x198   :  { %v1950_v3 = vmax.f32 %v1945_v13, %v404_v14 }
 0x19a   :  { %719 = vst.msk [vmem:[#allocation2 + $0x28] sm:$0xff] %vm2227_vm7, %v1950_v3  ;;  %vm2252_vm7 = vmmov %vm2236_vm0 }
 0x19b   :  { %v406_v16 = vpop.xlane.xlu1 %405 }
 0x19c   :  { %v1957_v18 = vmax.f32 %v1952_v15, %v406_v16 }
 0x19e   :  { %720 = vst.msk [vmem:[#allocation2 + $0x30] sm:$0xff] %vm2228_vm6, %v1957_v18  ;;  %vm2253_vm6 = vmmov %vm2236_vm0 }
 0x19f   :  { %v408_v22 = vpop.xlane.xlu1 %407 }
 0x1a0   :  { %v1964_v43 = vmax.f32 %v1959_v21, %v408_v22 }
 0x1a2   :  { %721 = vst.msk [vmem:[#allocation2 + $0x38] sm:$0xff] %vm2229_vm9, %v1964_v43  ;;  %vm2254_vm9 = vmmov %vm2236_vm0 }
 0x1a3   :  { %v410_v25 = vpop.xlane.xlu1 %409 }
 0x1a4   :  { %v1976_v28 = vmax.f32 %v1966_v24, %v410_v25  ;;  %v2049_v25 = vld [vmem:[#allocation2 + $0x68] sm:$0xff] }
 0x1a5   :  { %2235 = vst [vmem:[#allocation12_spill] sm:$0xff] %v2049_v25 }
 0x1a6   :  { %722 = vst.msk [vmem:[#allocation2 + $0x40] sm:$0xff] %vm2230_vm10, %v1976_v28  ;;  %vm2255_vm10 = vmmov %vm2236_vm0 }
 0x1a7   :  { %417 = vmax.xlane.f32.xlu0 %v1973_v26  ;;  %v412_v30 = vpop.xlane.xlu1 %411 }
 0x1a8   :  { %v1984_v32 = vmax.f32 %v1978_v29, %v412_v30 }
 0x1aa   :  { %723 = vst.msk [vmem:[#allocation2 + $0x48] sm:$0xff] %vm2231_vm11, %v1984_v32  ;;  %vm2256_vm11 = vmmov %vm2236_vm0 }
 0x1ab   :  { %v414_v33 = vpop.xlane.xlu1 %413 }
 0x1ac   :  { %v1993_v34 = vmax.f32 %v1986_v58, %v414_v33 }
 0x1ae   :  { %724 = vst.msk [vmem:[#allocation2 + $0x50] sm:$0xff] %vm2232_vm12, %v1993_v34  ;;  %vm2257_vm12 = vmmov %vm2236_vm0 }
 0x1af   :  { %v416_v37 = vpop.xlane.xlu1 %415 }
 0x1b0   :  { %v2000_v38 = vmax.f32 %v1995_v36, %v416_v37  ;;  %v2055_v37 = vld [vmem:[#allocation2 + $0x70] sm:$0xff] }
 0x1b1   :  { %2238 = vst [vmem:[#allocation14_spill] sm:$0xff] %v2055_v37 }
 0x1b2   :  { %725 = vst.msk [vmem:[#allocation2 + $0x58] sm:$0xff] %vm2233_vm14, %v2000_v38  ;;  %vm2258_vm14 = vmmov %vm2236_vm0 }
 0x1bd   :  { %538 = vperm.xlu0 %1258, %v1934_v6  }
 0x1c1   :  { %568 = vperm.xlu0 %1258, %v1984_v32  }
 0x1c5   :  { %578 = vperm.xlu0 %1258, %v2000_v38  }
 0x207   :  { %v524_v42 = vpop.permute.xlu0 %523 }
 0x208   :  { %v601_v45 = vsub.f32 %v1663_v52, %v524_v42  ;;  %v2025_v52 = vsel %vm312_vm13, %v1814_v27, -1e+30  ;;  %v473_v27 = vmul.f32 1.442695, %v457_v44  ;;  %v2065_v42 = vld [vmem:[#allocation2 + $0x78] sm:$0xff] }
 0x209   :  { %2241 = vst [vmem:[#allocation16_spill] sm:$0xff] %v2065_v42 }
 0x20a   :  { %v617_v50 = vmul.f32 1.442695, %v601_v45 }
 0x20c   :  { %1282 = vpow2.f32 %v617_v50 }
 0x20d   :  { %1284 = vpow2.f32 %v473_v27 }
 0x216   :  { %v1283_v53 = vpop.eup %1282 }
 0x217   :  { %649 = vadd.xlane.f32.xlu1 %v1283_v53  ;;  %v1285_v5 = vpop.eup %1284 }
 0x218   :  { %v505_v14 = vmul.f32 %v1285_v5, %v441_v7 }
 0x21b   :  { %419 = vmax.xlane.f32.xlu1 %v2013_v54 }
 0x21f   :  { %421 = vmax.xlane.f32.xlu1 %v2019_v56 }
 0x223   :  { %423 = vmax.xlane.f32.xlu1 %v2025_v52 }
 0x234   :  { %528 = vperm.xlu1 %1259, %v1919_v57   ;;  %v418_v31 = vpop.xlane.xlu0 %417 }
 0x235   :  { %v2032_v2 = vmax.f32 %v2028_v61, %v418_v31 }
 0x237   :  { %726 = vst.msk [vmem:[#allocation2 + $0x60] sm:$0xff] %vm2234_vm15, %v2032_v2  ;;  %vm2259_vm15 = vmmov %vm2236_vm0 }
 0x238   :  { %533 = vperm.xlu1 %1259, %v1927_v4  }
 0x23c   :  { %543 = vperm.xlu1 %1259, %v1943_v48  }
 0x240   :  { %548 = vperm.xlu1 %1259, %v1950_v3  }
 0x244   :  { %553 = vperm.xlu1 %1259, %v1957_v18  }
 0x248   :  { %558 = vperm.xlu1 %1259, %v1964_v43  }
 0x24c   :  { %563 = vperm.xlu1 %1259, %v1976_v28  }
 0x250   :  { %573 = vperm.xlu1 %1259, %v1993_v34  }
 0x254   :  { %583 = vperm.xlu1 %1259, %v2032_v2  }
 0x2a4   :  { %v650_v16 = vpop.xlane.xlu1 %649 }
 0x2a5   :  { %v681_v22 = vadd.f32 %v650_v16, %v505_v14  ;;  %v1118_v14 = vld [vmem:[#allocation5] sm:$0x1] }
 0x2a7   :  { %698 = vst.msk [vmem:[#allocation3] sm:$0xff] %vm2236_vm0, %v681_v22 }
 0x2a8   :  { %v420_v30 = vpop.xlane.xlu1 %419 }
 0x2a9   :  { %v2053_v33 = vmax.f32 %v2049_v25, %v420_v30 }
 0x2ab   :  { %2237 = vst [vmem:[#allocation13_spill] sm:$0xff] %v2053_v33  ;;  %727 = vst.msk [vmem:[#allocation2 + $0x68] sm:$0xff] %vm2239_vm5, %v2053_v33  ;;  %588 = vperm.xlu0 %1258, %v2053_v33  }
 0x2ac   :  { %v422_v60 = vpop.xlane.xlu1 %421  ;;  %vm2260_vm5 = vmmov %vm2236_vm0 }
 0x2ad   :  { %v2063_v44 = vmax.f32 %v2055_v37, %v422_v60  ;;  %v1117_v37 = vld [vmem:[#allocation4] sm:$0x1] }
 0x2ae   :  { %v989_v7 = vld [vmem:[#allocation3] sm:$0xff] }
 0x2af   :  { %2240 = vst [vmem:[#allocation15_spill] sm:$0xff] %v2063_v44  ;;  %728 = vst.msk [vmem:[#allocation2 + $0x70] sm:$0xff] %vm2242_vm1, %v2063_v44  ;;  %593 = vperm.xlu1 %1259, %v2063_v44   ;;  %1286 = vlog2.f32 %v989_v7 }
 0x2b0   :  { %v424_v50 = vpop.xlane.xlu1 %423  ;;  %1288 = vlog2.f32 %v1118_v14  ;;  %vm2261_vm1 = vmmov %vm2236_vm0 }
 0x2b1   :  { %v2073_v53 = vmax.f32 %v2065_v42, %v424_v50  ;;  %v539_v50 = vpop.permute.xlu0 %538 }
 0x2b2   :  { %v604_v12 = vsub.f32 %v1837_v35, %v539_v50 }
 0x2b3   :  { %2243 = vst [vmem:[#allocation17_spill] sm:$0xff] %v2073_v53  ;;  %729 = vst.msk [vmem:[#allocation2 + $0x78] sm:$0xff] %vm2244_vm2, %v2073_v53  ;;  %598 = vperm.xlu0 %1258, %v2073_v53  }
 0x2b4   :  { %v529_v27 = vpop.permute.xlu1 %528  ;;  %v623_v7 = vmul.f32 1.442695, %v604_v12 }
 0x2b5   :  { %v602_v30 = vsub.f32 %v1708_v62, %v529_v27  ;;  %v973_v27 = vld [vmem:[#allocation2] sm:$0xff]  ;;  %v569_v25 = vpop.permute.xlu0 %568 }
 0x2b7   :  { %v619_v41 = vmul.f32 1.442695, %v602_v30 }
 0x2b8   :  { %v534_v5 = vpop.permute.xlu1 %533 }
 0x2b9   :  { %v1287_v45 = vpop.eup %1286  ;;  %v603_v31 = vsub.f32 %v1765_v11, %v534_v5  ;;  %1290 = vpow2.f32 %v619_v41 }
 0x2ba   :  { %v1289_v55 = vpop.eup %1288  ;;  %v1006_v49 = vmul.f32 0.6931472, %v1287_v45 }
 0x2bb   :  { %v1120_v23 = vmul.f32 0.6931472, %v1289_v55  ;;  %v621_v53 = vmul.f32 1.442695, %v603_v31 }
 0x2bc   :  { %v544_v16 = vpop.permute.xlu1 %543  ;;  %v1037_v44 = vadd.f32 %v1006_v49, %v973_v27 }
 0x2bd   :  { %v605_v42 = vsub.f32 %v1849_v39, %v544_v16  ;;  %v1121_v33 = vadd.f32 %v1120_v23, %v1117_v37  ;;  %1292 = vpow2.f32 %v621_v53  ;;  %v579_v37 = vpop.permute.xlu0 %578 }
 0x2be   :  { %1294 = vpow2.f32 %v623_v7  ;;  %v1070_v39 = vsel %vm2245_vm3, %v1037_v44, 0.0 }
 0x2bf   :  { %v625_v11 = vmul.f32 1.442695, %v605_v42  ;;  %v612_v42 = vsub.f32 %v1904_v10, %v579_v37 }
 0x2c0   :  { %v549_v22 = vpop.permute.xlu1 %548 }
 0x2c1   :  { %v606_v14 = vsub.f32 %v1854_v51, %v549_v22  ;;  %v1123_v51 = vsel %vm312_vm13, %v1121_v33, 0.0  ;;  %1296 = vpow2.f32 %v625_v11  ;;  %v639_v31 = vmul.f32 1.442695, %v612_v42 }
 0x2c2   :  { %vm319_vm13 = vcmask 0  }
 0x2c3   :  { %v627_v45 = vmul.f32 1.442695, %v606_v14  ;;  %v2246_v14 = vmov 0.0  }
 0x2c4   :  { %v554_v60 = vpop.permute.xlu1 %553  ;;  %322 = vst.msk [vmem:[#allocation8] sm:$0x1] %vm319_vm13, %v2246_v14  ;;  %320 = vst.msk [vmem:[#allocation6] sm:$0x1] %vm319_vm13, %v2246_v14 }
 0x2c5   :  { %v607_v35 = vsub.f32 %v1864_v63, %v554_v60  ;;  %v610_v63 = vsub.f32 %v1892_v46, %v569_v25  ;;  %1298 = vpow2.f32 %v627_v45  ;;  %321 = vst.msk [vmem:[#allocation7] sm:$0x1] %vm319_vm13, %v2246_v14  ;;  %v445_v14 = vld [vmem:[#allocation3 + $0x20] sm:$0xff] }
 0x2c7   :  { %v629_v49 = vmul.f32 1.442695, %v607_v35  ;;  %v635_v33 = vmul.f32 1.442695, %v610_v63 }
 0x2c8   :  { %v559_v20 = vpop.permute.xlu1 %558 }
 0x2c9   :  { %v608_v55 = vsub.f32 %v1877_v17, %v559_v20  ;;  %v1125_v17 = vsel %vm1124_vm4, %v1123_v51, 0.0  ;;  %v1291_v20 = vpop.eup %1290  ;;  %1300 = vpow2.f32 %v629_v49 }
 0x2ca   :  { %v1293_v53 = vpop.eup %1292 }
 0x2cb   :  { %v631_v41 = vmul.f32 1.442695, %v608_v55 }
 0x2cc   :  { %v564_v62 = vpop.permute.xlu1 %563 }
 0x2cd   :  { %v609_v23 = vsub.f32 %v1884_v0, %v564_v62  ;;  %1302 = vpow2.f32 %v631_v41  ;;  %v459_v41 = vsub.f32 %v1922_v1, %v1927_v4  ;;  %v464_v1 = vsub.f32 %v1959_v21, %v1964_v43  ;;  %v443_v21 = vld [vmem:[#allocation3 + $0x10] sm:$0xff] }
 0x2ce   :  { %v2248_v43 = vsub.f32 %v1978_v29, %v1984_v32 }
 0x2cf   :  { %v633_v44 = vmul.f32 1.442695, %v609_v23  ;;  %v477_v37 = vmul.f32 1.442695, %v459_v41 }
 0x2d0   :  { %v574_v12 = vpop.permute.xlu1 %573 }
 0x2d1   :  { %v611_v19 = vsub.f32 %v1898_v9, %v574_v12  ;;  %1304 = vpow2.f32 %v633_v44  ;;  %v462_v44 = vsub.f32 %v1945_v13, %v1950_v3 }
 0x2d2   :  { %1101 = vadd.xlane.f32.xlu0 %v1070_v39  ;;  %1306 = vpow2.f32 %v635_v33  ;;  %v442_v33 = vld [vmem:[#allocation3 + $0x8] sm:$0xff] }
 0x2d3   :  { %957 = vadd.xlane.f32.xlu1 %v1887_v8  ;;  %v1295_v8 = vpop.eup %1294  ;;  %v637_v46 = vmul.f32 1.442695, %v611_v19 }
 0x2d4   :  { %v584_v0 = vpop.permute.xlu1 %583  ;;  %v1297_v5 = vpop.eup %1296 }
 0x2d5   :  { %v613_v25 = vsub.f32 %v1973_v26, %v584_v0  ;;  %v1299_v16 = vpop.eup %1298  ;;  %1308 = vpow2.f32 %v637_v46 }
 0x2d6   :  { %1126 = vadd.xlane.f32.xlu0 %v1125_v17  ;;  %1310 = vpow2.f32 %v639_v31  ;;  %v1301_v10 = vpop.eup %1300  ;;  %v461_v17 = vsub.f32 %v1936_v47, %v1943_v48  ;;  %v465_v47 = vsub.f32 %v1966_v24, %v1976_v28  ;;  %v491_v24 = vmul.f32 1.442695, %v2248_v43 }
 0x2d7   :  { %651 = vadd.xlane.f32.xlu1 %v1291_v20  ;;  %v641_v9 = vmul.f32 1.442695, %v613_v25  ;;  %v1303_v22 = vpop.eup %1302 }
 0x2d8   :  { %v481_v19 = vmul.f32 1.442695, %v461_v17  ;;  %v447_v17 = vld [vmem:[#allocation3 + $0x30] sm:$0xff] }
 0x2d9   :  { %1312 = vpow2.f32 %v641_v9 }
 0x2da   :  { %653 = vadd.xlane.f32.xlu0 %v1293_v53 }
 0x2db   :  { %655 = vadd.xlane.f32.xlu1 %v1295_v8  ;;  %v1305_v30 = vpop.eup %1304 }
 0x2dc   :  { %v1307_v60 = vpop.eup %1306 }
 0x2de   :  { %657 = vadd.xlane.f32.xlu0 %v1297_v5 }
 0x2df   :  { %659 = vadd.xlane.f32.xlu1 %v1299_v16  ;;  %v1309_v26 = vpop.eup %1308 }
 0x2e0   :  { %v1311_v50 = vpop.eup %1310 }
 0x2e2   :  { %661 = vadd.xlane.f32.xlu0 %v1301_v10  ;;  %v444_v10 = vld [vmem:[#allocation3 + $0x18] sm:$0xff] }
 0x2e3   :  { %663 = vadd.xlane.f32.xlu1 %v1303_v22  ;;  %v1313_v7 = vpop.eup %1312 }
 0x2e6   :  { %665 = vadd.xlane.f32.xlu0 %v1305_v30  ;;  %v2249_v30 = vsub.f32 %v1995_v36, %v2000_v38  ;;  %v2251_v36 = vsub.f32 %v2028_v61, %v2032_v2  ;;  %v448_v2 = vld [vmem:[#allocation3 + $0x38] sm:$0xff] }
 0x2e7   :  { %667 = vadd.xlane.f32.xlu1 %v1307_v60 }
 0x2e8   :  { %v495_v29 = vmul.f32 1.442695, %v2249_v30  ;;  %v497_v38 = vmul.f32 1.442695, %v2251_v36 }
 0x2ea   :  { %669 = vadd.xlane.f32.xlu0 %v1309_v26 }
 0x2eb   :  { %671 = vadd.xlane.f32.xlu1 %v1311_v50 }
 0x2ee   :  { %673 = vadd.xlane.f32.xlu0 %v1313_v7 }
 0x32a   :  { %v589_v62 = vpop.permute.xlu0 %588 }
 0x32b   :  { %v614_v27 = vsub.f32 %v2013_v54, %v589_v62  ;;  %v458_v54 = vsub.f32 %v1909_v59, %v1919_v57  ;;  %v463_v59 = vsub.f32 %v1952_v15, %v1957_v18  ;;  %v483_v57 = vmul.f32 1.442695, %v462_v44 }
 0x32c   :  { %v489_v15 = vmul.f32 1.442695, %v465_v47  ;;  %v467_v18 = vsub.f32 %v1986_v58, %v1993_v34 }
 0x32d   :  { %v643_v11 = vmul.f32 1.442695, %v614_v27  ;;  %v485_v4 = vmul.f32 1.442695, %v463_v59 }
 0x32e   :  { %v594_v35 = vpop.permute.xlu1 %593  ;;  %v493_v22 = vmul.f32 1.442695, %v467_v18 }
 0x32f   :  { %1314 = vpow2.f32 %v643_v11  ;;  %v615_v45 = vsub.f32 %v2019_v56, %v594_v35  ;;  %v475_v56 = vmul.f32 1.442695, %v458_v54 }
 0x331   :  { %v645_v55 = vmul.f32 1.442695, %v615_v45 }
 0x332   :  { %v599_v39 = vpop.permute.xlu0 %598 }
 0x333   :  { %1316 = vpow2.f32 %v645_v55  ;;  %v616_v12 = vsub.f32 %v2025_v52, %v599_v39  ;;  %v2247_v52 = vsub.f32 %v1929_v40, %v1934_v6  ;;  %v487_v40 = vmul.f32 1.442695, %v464_v1  ;;  %v446_v55 = vld [vmem:[#allocation3 + $0x28] sm:$0xff] }
 0x335   :  { %v647_v51 = vmul.f32 1.442695, %v616_v12  ;;  %v479_v20 = vmul.f32 1.442695, %v2247_v52 }
 0x337   :  { %1318 = vpow2.f32 %v647_v51 }
 0x338   :  { %1320 = vpow2.f32 %v475_v56 }
 0x339   :  { %v1315_v49 = vpop.eup %1314  ;;  %1322 = vpow2.f32 %v477_v37 }
 0x33a   :  { %675 = vadd.xlane.f32.xlu1 %v1315_v49  ;;  %1324 = vpow2.f32 %v479_v20 }
 0x33b   :  { %1326 = vpow2.f32 %v481_v19 }
 0x33c   :  { %1328 = vpow2.f32 %v483_v57 }
 0x33d   :  { %v1317_v23 = vpop.eup %1316  ;;  %1330 = vpow2.f32 %v485_v4 }
 0x33e   :  { %677 = vadd.xlane.f32.xlu0 %v1317_v23  ;;  %1332 = vpow2.f32 %v487_v40  ;;  %v449_v40 = vld [vmem:[#allocation3 + $0x40] sm:$0xff] }
 0x33f   :  { %1334 = vpow2.f32 %v489_v15 }
 0x340   :  { %1336 = vpow2.f32 %v491_v24 }
 0x341   :  { %v1319_v63 = vpop.eup %1318  ;;  %1338 = vpow2.f32 %v493_v22 }
 0x342   :  { %679 = vadd.xlane.f32.xlu1 %v1319_v63  ;;  %v1321_v48 = vpop.eup %1320  ;;  %1340 = vpow2.f32 %v495_v29  ;;  %v925_v29 = vld [vmem:[#allocation8] sm:$0x1] }
 0x343   :  { %v1323_v42 = vpop.eup %1322  ;;  %v506_v46 = vmul.f32 %v1321_v48, %v442_v33  ;;  %1342 = vpow2.f32 %v497_v38 }
 0x344   :  { %v1325_v25 = vpop.eup %1324  ;;  %v507_v9 = vmul.f32 %v1323_v42, %v443_v21  ;;  %v451_v21 = vld [vmem:[#allocation3 + $0x50] sm:$0xff] }
 0x345   :  { %v1327_v26 = vpop.eup %1326  ;;  %v508_v7 = vmul.f32 %v1325_v25, %v444_v10 }
 0x346   :  { %v1329_v27 = vpop.eup %1328  ;;  %v509_v49 = vmul.f32 %v1327_v26, %v445_v14 }
 0x347   :  { %v1331_v54 = vpop.eup %1330  ;;  %v510_v56 = vmul.f32 %v1329_v27, %v446_v55 }
 0x348   :  { %v1333_v52 = vpop.eup %1332  ;;  %v511_v59 = vmul.f32 %v1331_v54, %v447_v17 }
 0x349   :  { %v1335_v1 = vpop.eup %1334  ;;  %v512_v47 = vmul.f32 %v1333_v52, %v448_v2 }
 0x34a   :  { %v513_v42 = vmul.f32 %v1335_v1, %v449_v40 }
 0x35f   :  { %v1102_v6 = vpop.xlane.xlu0 %1101 }
 0x360   :  { %v1103_v13 = vrot.slane %v1102_v6, 4  ;;  %v958_v3 = vpop.xlane.xlu1 %957 }
 0x361   :  { %v959_v0 = vrot.slane %v958_v3, 4 }
 0x362   :  { %v1104_v28 = vadd.f32 %v1103_v13, %v1102_v6  ;;  %v1337_v6 = vpop.eup %1336 }
 0x363   :  { %v960_v53 = vadd.f32 %v959_v0, %v958_v3  ;;  %v1127_v8 = vpop.xlane.xlu0 %1126  ;;  %v450_v3 = vld [vmem:[#allocation3 + $0x48] sm:$0xff]  ;;  %v1339_v15 = vpop.eup %1338 }
 0x364   :  { %v1105_v31 = vrot.slane %v1104_v28, 2  ;;  %v1128_v5 = vrot.slane %v1127_v8, 4  ;;  %v652_v16 = vpop.xlane.xlu1 %651  ;;  %v514_v0 = vmul.f32 %v1337_v6, %v450_v3  ;;  %v1341_v43 = vpop.eup %1340 }
 0x365   :  { %v961_v58 = vrot.slane %v960_v53, 2  ;;  %v682_v34 = vadd.f32 %v652_v16, %v506_v46  ;;  %v515_v46 = vmul.f32 %v1339_v15, %v451_v21  ;;  %v1343_v25 = vpop.eup %1342  ;;  %v453_v16 = vld [vmem:[#allocation3 + $0x60] sm:$0xff] }
 0x366   :  { %v1129_v32 = vadd.f32 %v1128_v5, %v1127_v8  ;;  %v1106_v60 = vadd.f32 %v1105_v31, %v1104_v28 }
 0x367   :  { %699 = vst.msk [vmem:[#allocation3 + $0x8] sm:$0xff] %vm2250_vm8, %v682_v34  ;;  %v654_v50 = vpop.xlane.xlu0 %653  ;;  %v962_v62 = vadd.f32 %v961_v58, %v960_v53  ;;  %v452_v53 = vld [vmem:[#allocation3 + $0x58] sm:$0xff]  ;;  %v517_v58 = vmul.f32 %v1343_v25, %v453_v16 }
 0x368   :  { %v1130_v11 = vrot.slane %v1129_v32, 2  ;;  %v683_v35 = vadd.f32 %v654_v50, %v507_v9  ;;  %v656_v45 = vpop.xlane.xlu1 %655  ;;  %v1107_v39 = vrot.slane %v1106_v60, 1  ;;  %v516_v5 = vmul.f32 %v1341_v43, %v452_v53 }
 0x369   :  { %v684_v12 = vadd.f32 %v656_v45, %v508_v7  ;;  %v963_v51 = vrot.slane %v962_v62, 1  ;;  %v1122_v7 = vld [vmem:[#allocation7] sm:$0x1] }
 0x36a   :  { %700 = vst.msk [vmem:[#allocation3 + $0x10] sm:$0xff] %vm2252_vm7, %v683_v35  ;;  %v1108_v23 = vadd.f32 %v1107_v39, %v1106_v60  ;;  %v1131_v63 = vadd.f32 %v1130_v11, %v1129_v32  ;;  %v1053_v32 = vld [vmem:[#allocation6] sm:$0x1] }
 0x36b   :  { %701 = vst.msk [vmem:[#allocation3 + $0x18] sm:$0xff] %vm2253_vm6, %v684_v12  ;;  %v658_v41 = vpop.xlane.xlu0 %657  ;;  %v964_v37 = vadd.f32 %v963_v51, %v962_v62 }
 0x36c   :  { %v685_v20 = vadd.f32 %v658_v41, %v509_v49  ;;  %v660_v44 = vpop.xlane.xlu1 %659  ;;  %v1132_v61 = vrot.slane %v1131_v63, 1 }
 0x36d   :  { %v686_v19 = vadd.f32 %v660_v44, %v510_v56  ;;  %1248 = vpush %v964_v37 }
 0x36e   :  { %702 = vst.msk [vmem:[#allocation3 + $0x20] sm:$0xff] %vm2254_vm9, %v685_v20  ;;  %v1133_v57 = vadd.f32 %v1132_v61, %v1131_v63 }
 0x36f   :  { %1250 = vpush %v1108_v23  ;;  %v662_v4 = vpop.xlane.xlu0 %661 }
 0x370   :  { %703 = vst.msk [vmem:[#allocation3 + $0x28] sm:$0xff] %vm2255_vm10, %v686_v19  ;;  %v687_v48 = vadd.f32 %v662_v4, %v511_v59  ;;  %v664_v13 = vpop.xlane.xlu1 %663 }
 0x371   :  { %1252 = vpush %v1133_v57  ;;  %v688_v33 = vadd.f32 %v664_v13, %v512_v47 }
 0x372   :  { %704 = vst.msk [vmem:[#allocation3 + $0x30] sm:$0xff] %vm2256_vm11, %v687_v48 }
 0x373   :  { %705 = vst.msk [vmem:[#allocation3 + $0x38] sm:$0xff] %vm2257_vm12, %v688_v33  ;;  %v666_v18 = vpop.xlane.xlu0 %665 }
 0x374   :  { %v689_v24 = vadd.f32 %v666_v18, %v513_v42  ;;  %v668_v28 = vpop.xlane.xlu1 %667 }
 0x375   :  { %v690_v8 = vadd.f32 %v668_v28, %v514_v0 }
 0x376   :  { %706 = vst.msk [vmem:[#allocation3 + $0x40] sm:$0xff] %vm2258_vm14, %v689_v24 }
 0x377   :  { %707 = vst.msk [vmem:[#allocation3 + $0x48] sm:$0xff] %vm2259_vm15, %v690_v8  ;;  %v670_v31 = vpop.xlane.xlu0 %669 }
 0x378   :  { %v691_v9 = vadd.f32 %v670_v31, %v515_v46  ;;  %v672_v10 = vpop.xlane.xlu1 %671 }
 0x379   :  { %v692_v22 = vadd.f32 %v672_v10, %v516_v5 }
 0x37a   :  { %708 = vst.msk [vmem:[#allocation3 + $0x50] sm:$0xff] %vm2236_vm0, %v691_v9 }
 0x37b   :  { %709 = vst.msk [vmem:[#allocation3 + $0x58] sm:$0xff] %vm2260_vm5, %v692_v22  ;;  %v674_v34 = vpop.xlane.xlu0 %673 }
 0x37c   :  { %v693_v30 = vadd.f32 %v674_v34, %v517_v58 }
 0x37e   :  { %710 = vst.msk [vmem:[#allocation3 + $0x60] sm:$0xff] %vm2261_vm1, %v693_v30 }
 0x39e   :  { %s1249_s2 = spop %1248 }
 0x39f   :  { %v966_v60 = vstv %s1249_s2 }
 0x3a0   :  { %s1251_s18 = spop %1250  ;;  %v967_v26 = vadd.f32 %v966_v60, %v925_v29 }
 0x3a1   :  { %v1110_v50 = vstv %s1251_s18 }
 0x3a2   :  { %v1111_v14 = vadd.f32 %v1110_v50, %v1053_v32  ;;  %s1253_s19 = spop %1252  ;;  %969 = vst.msk [vmem:[#allocation8] sm:$0x1] %vm319_vm13, %v967_v26 }
 0x3a3   :  { %v1135_v62 = vstv %s1253_s19 }
 0x3a4   :  { %1113 = vst.msk [vmem:[#allocation6] sm:$0x1] %vm319_vm13, %v1111_v14  ;;  %v1136_v27 = vadd.f32 %v1135_v62, %v1122_v7 }
 0x3a6   :  { %1138 = vst.msk [vmem:[#allocation7] sm:$0x1] %vm319_vm13, %v1136_v27 }
 0x3a9   :  { %v1144_v11 = vld [vmem:[#allocation8] sm:$0x1] }
 0x3aa   :  { %v1145_v39 = vmul.f32 2.0, %v1144_v11 }
 0x3ab   :  { %v1141_v35 = vld [vmem:[#allocation6] sm:$0x1] }
 0x3ad   :  { %v1142_v45 = vld [vmem:[#allocation7] sm:$0x1] }
 0x3ae   :  { %v1143_v55 = vadd.f32 %v1142_v45, %v1141_v35 }
 0x3b0   :  { %v1146_v36 = vsub.f32 %v1143_v55, %v1145_v39 }
 0x3b2   :  { %v1147_v38 = vmul.f32 0.0625, %v1146_v36 }
 0x3b4   :  { %1149 = vst.msk [vmem:[#allocation9] sm:$0x1] %vm319_vm13, %v1147_v38 }
 0x3b5   :  { %1361 = shalt.err (!%p1358_p4)
}
 0x3b6   :  { %s1362_s26 = scalar_lea.hbm %s2176_s3, 16 }
 0x3b7   :  { %p1363_p5 = scmp.ne.s32.totalorder %s2176_s3, %s1362_s26  ;;  %p1366_p6 = scmp.lt.u32.totalorder %s1362_s26, %s2176_s3 }
 0x3b9   :  { %p1368_p7 = pnand %p1366_p6, %p1363_p5 }
 0x3bb   :  { %1371 = shalt.err (!%p1368_p7)
}
 0x3bc   :  { %1161 = dma.vmem_to_hbm [thread:$0]  %s1159_s21, 16, %s2176_s3, [#allocation10]   ;;  %v2262_v12 = vld [vmem:[#allocation12_spill] sm:$0xff]  ;;  %v2263_v51 = vld [vmem:[#allocation13_spill] sm:$0xff]  ;;  %v2265_v63 = vld [vmem:[#allocation14_spill] sm:$0xff] }
 0x3bd   :  { %v2264_v49 = vsub.f32 %v2262_v12, %v2263_v51  ;;  %v2266_v54 = vld [vmem:[#allocation15_spill] sm:$0xff]  ;;  %v2268_v37 = vld [vmem:[#allocation16_spill] sm:$0xff]  ;;  %v2269_v17 = vld [vmem:[#allocation17_spill] sm:$0xff] }
 0x3be   :  { %v2267_v41 = vsub.f32 %v2265_v63, %v2266_v54  ;;  %v2270_v52 = vsub.f32 %v2268_v37, %v2269_v17  ;;  %v454_v61 = vld [vmem:[#allocation3 + $0x68] sm:$0xff]  ;;  %v455_v57 = vld [vmem:[#allocation3 + $0x70] sm:$0xff]  ;;  %vm2271_vm2 = vmmov %vm2236_vm0 }
 0x3bf   :  { %v499_v23 = vmul.f32 1.442695, %v2264_v49  ;;  %v456_v6 = vld [vmem:[#allocation3 + $0x78] sm:$0xff]  ;;  %vm2272_vm3 = vmmov %vm2236_vm0 }
 0x3c0   :  { %v501_v56 = vmul.f32 1.442695, %v2267_v41  ;;  %v503_v20 = vmul.f32 1.442695, %v2270_v52  ;;  %vm2273_vm4 = vmmov %vm2236_vm0 }
 0x3c1   :  { %1344 = vpow2.f32 %v499_v23 }
 0x3c2   :  { %1346 = vpow2.f32 %v501_v56 }
 0x3c3   :  { %1348 = vpow2.f32 %v503_v20 }
 0x3c7   :  { %v676_v59 = vpop.xlane.xlu1 %675 }
 0x3cb   :  { %v1345_v44 = vpop.eup %1344  ;;  %v678_v40 = vpop.xlane.xlu0 %677 }
 0x3cc   :  { %v518_v2 = vmul.f32 %v1345_v44, %v454_v61  ;;  %v1347_v19 = vpop.eup %1346 }
 0x3cd   :  { %v519_v4 = vmul.f32 %v1347_v19, %v455_v57  ;;  %v1349_v47 = vpop.eup %1348 }
 0x3ce   :  { %v694_v1 = vadd.f32 %v676_v59, %v518_v2  ;;  %v520_v13 = vmul.f32 %v1349_v47, %v456_v6 }
 0x3cf   :  { %v695_v48 = vadd.f32 %v678_v40, %v519_v4  ;;  %v680_v3 = vpop.xlane.xlu1 %679 }
 0x3d0   :  { %711 = vst.msk [vmem:[#allocation3 + $0x68] sm:$0xff] %vm2271_vm2, %v694_v1  ;;  %v696_v33 = vadd.f32 %v680_v3, %v520_v13 }
 0x3d1   :  { %712 = vst.msk [vmem:[#allocation3 + $0x70] sm:$0xff] %vm2272_vm3, %v695_v48 }
 0x3d2   :  { %713 = vst.msk [vmem:[#allocation3 + $0x78] sm:$0xff] %vm2273_vm4, %v696_v33 }
 0x3d3   :  { %1372 = dma.done.wait [#allocation10], 16  }
 0x3d4   :  { %1373 = vsyncadd [#allocation10], 4294967280 }
 0x3d5   :  { %1167 = vsyncpa [#allocation10], 1 }

</bundles_post_ra>
